<compile_context>
chip_gen: v7x
topology: tpu7x:2x2x1
jax: 0.10.0
libtpu: 0.0.40
codegen_flags: <defaults>
</compile_context>

<pallas_src>
import math
import functools

import jax
import jax.numpy as jnp
from jax import lax
from jax.experimental import pallas as pl
from jax.experimental.pallas import tpu as pltpu


MXU_DTYPE = jnp.bfloat16   # MXU operand dtype; accumulation stays f32
LN_EPS = 1e-5              # PyTorch nn.LayerNorm default


# ----------------------------- in-kernel helpers ----------------------------

def _matmul(a_bf16, w_bf16):
    """a[M, K] @ w[N, K]^T, bf16 operands, f32 accumulation (PyTorch weight
    layout [out_features, in_features]; contraction on dim 1 of both)."""
    return lax.dot_general(a_bf16, w_bf16,
                           dimension_numbers=(((1,), (1,)), ((), ())),
                           preferred_element_type=jnp.float32)


def _layernorm(x, g, b):
    # f32 statistics, biased variance (matches nn.LayerNorm).
    mu = jnp.mean(x, axis=-1, keepdims=True)
    var = jnp.mean((x - mu) ** 2, axis=-1, keepdims=True)
    return (x - mu) * lax.rsqrt(var + LN_EPS) * g + b


# ----------------------------- the fused kernel ------------------------------

def transformer_stack_kernel(x_ref, wqkv_ref, bqkv_ref, wout_ref, bout_ref,
                             ln1_g_ref, ln1_b_ref, w1_ref, b1_ref,
                             w2_ref, b2_ref, ln2_g_ref, ln2_b_ref,
                             dec_w_ref, dec_b_ref,
                             logits_ref,
                             x_sc, qkv_sc, heads_sc, o_sc, *, nhead):
    """Grid = (batch, nlayer).  One grid step = one encoder layer for one
    batch element; the residual stream lives in x_sc (VMEM) across layers.
    The last layer step also does mean-pool + decoder and writes the logits.
    """
    l = pl.program_id(1)
    nlayer = pl.num_programs(1)
    S, D = x_sc.shape
    hd = D // nhead

    # ---- layer 0: load this batch element's embedded sequence into VMEM ----
    @pl.when(l == 0)
    def _():
        x_sc[...] = x_ref[0].astype(jnp.float32)

    xf = x_sc[...]                                   # [S, D] f32 residual stream
    x_bf = xf.astype(MXU_DTYPE)                      # hoisted cast for the MXU

    # ---- fused QKV projection (scale pre-folded into the Q rows) -----------
    qkv = _matmul(x_bf, wqkv_ref[0]) + bqkv_ref[0]   # [S, 3D] f32
    qkv_sc[...] = qkv.astype(MXU_DTYPE)

    # ---- head-major marshal via static ref slices: heads_sc[i, h] = [S, hd] -
    for i in range(3):                               # 0=q, 1=k, 2=v
        for h in range(nhead):
            off = i * D + h * hd
            heads_sc[i, h] = qkv_sc[:, off:off + hd]
    q = heads_sc[0]                                  # [H, S, hd] bf16
    k = heads_sc[1]
    v = heads_sc[2]

    # ---- head-batched attention (single softmax over [H, S, S]) ------------
    s = jnp.einsum('hqd,hkd->hqk', q, k, preferred_element_type=jnp.float32)
    s = s - jnp.max(s, axis=-1, keepdims=True)
    p = jnp.exp(s)
    p = p * pl.reciprocal(jnp.sum(p, axis=-1, keepdims=True), approx=True)
    o = jnp.einsum('hqk,hkd->hqd', p.astype(MXU_DTYPE), v,
                   preferred_element_type=jnp.float32)        # [H, S, hd] f32

    # concatenate head outputs back to [S, D] lanes, then ONE out-projection
    for h in range(nhead):
        o_sc[:, h * hd:(h + 1) * hd] = o[h].astype(MXU_DTYPE)
    attn = _matmul(o_sc[...], wout_ref[0]) + bout_ref[0]      # [S, D] f32

    # ---- residual + LayerNorm 1 (post-LN) -----------------------------------
    x1 = _layernorm(xf + attn, ln1_g_ref[0], ln1_b_ref[0])

    # ---- feed-forward: Linear -> ReLU -> Linear ------------------------------
    h1 = jnp.maximum(_matmul(x1.astype(MXU_DTYPE), w1_ref[0]) + b1_ref[0], 0.0)
    ff = _matmul(h1.astype(MXU_DTYPE), w2_ref[0]) + b2_ref[0]

    # ---- residual + LayerNorm 2 ----------------------------------------------
    x2 = _layernorm(x1 + ff, ln2_g_ref[0], ln2_b_ref[0])
    x_sc[...] = x2

    # ---- last layer: mean-pool over seq + decoder, lane-dense store ---------
    @pl.when(l == nlayer - 1)
    def _():
        pooled = jnp.mean(x2, axis=0, keepdims=True)          # [1, D]
        logits = _matmul(pooled.astype(MXU_DTYPE), dec_w_ref[...]) + dec_b_ref[...]
        logits_ref[...] = logits.reshape(1, 1, -1).astype(logits_ref.dtype)


# ----------------------------- kernel wrapper --------------------------------

def fused_transformer_stack(x, pp, nhead):
    """x: [B, S, D] embedded + position-encoded input.
    Returns lane-padded logits [B, 1, NC_PAD] (f32)."""
    B, S, D = x.shape
    L = pp["wqkv"].shape[0]
    hd = D // nhead
    nc_pad = pp["dec_w"].shape[0]

    def lspec(arr):  # per-layer stacked param: pick layer l's block
        _, r, c = arr.shape
        return pl.BlockSpec((1, r, c), lambda b, l: (l, 0, 0))

    grid_spec = pltpu.PrefetchScalarGridSpec(
        num_scalar_prefetch=0,
        grid=(B, L),                                  # (parallel, arbitrary)
        in_specs=[
            pl.BlockSpec((1, S, D), lambda b, l: (b, 0, 0)),    # x (read at l==0)
            lspec(pp["wqkv"]), lspec(pp["bqkv"]),
            lspec(pp["wout"]), lspec(pp["bout"]),
            lspec(pp["ln1_g"]), lspec(pp["ln1_b"]),
            lspec(pp["w1"]), lspec(pp["b1"]),
            lspec(pp["w2"]), lspec(pp["b2"]),
            lspec(pp["ln2_g"]), lspec(pp["ln2_b"]),
            pl.BlockSpec((nc_pad, D), lambda b, l: (0, 0)),     # decoder W (once)
            pl.BlockSpec((1, nc_pad), lambda b, l: (0, 0)),     # decoder b (once)
        ],
        out_specs=pl.BlockSpec((1, 1, nc_pad), lambda b, l: (b, 0, 0)),
        scratch_shapes=[
            pltpu.VMEM((S, D), jnp.float32),            # resident residual stream
            pltpu.VMEM((S, 3 * D), MXU_DTYPE),          # fused QKV result
            pltpu.VMEM((3, nhead, S, hd), MXU_DTYPE),   # head-major q/k/v
            pltpu.VMEM((S, D), MXU_DTYPE),              # concatenated head outputs
        ],
    )
    return pl.pallas_call(
        functools.partial(transformer_stack_kernel, nhead=nhead),
        out_shape=jax.ShapeDtypeStruct((B, 1, nc_pad), jnp.float32),
        grid_spec=grid_spec,
        compiler_params=pltpu.CompilerParams(
            dimension_semantics=("parallel", "arbitrary")),
        # TODO(synk): for large S, tile the query rows flash-style and set
        # vmem_limit_bytes explicitly (v7x has 64 MiB VMEM vs 128 on v5e/v6e).
    )(x, pp["wqkv"], pp["bqkv"], pp["wout"], pp["bout"],
      pp["ln1_g"], pp["ln1_b"], pp["w1"], pp["b1"], pp["w2"], pp["b2"],
      pp["ln2_g"], pp["ln2_b"], pp["dec_w"], pp["dec_b"])


# ----------------------------- model (glue in JAX) ---------------------------

def positional_encoding(S, D):
    # Standard sinusoidal PE; constant-folded by XLA at compile time.
    # (Assumes even D, like the PyTorch tutorial PositionalEncoding.)
    pos = jnp.arange(S, dtype=jnp.float32)[:, None]
    div = jnp.exp(jnp.arange(0, D, 2, dtype=jnp.float32) * (-math.log(10000.0) / D))
    pe = jnp.zeros((S, D), jnp.float32)
    pe = pe.at[:, 0::2].set(jnp.sin(pos * div))
    pe = pe.at[:, 1::2].set(jnp.cos(pos * div))
    return pe


def transformer_forward(prepped, src, hidden_state=None, *, nhead, nclass):
    # hidden_state is unused in the PyTorch forward; kept for API parity.
    # Dropout layers are identity in eval mode; has_mask=False -> no attn mask.
    S, B = src.shape
    D = prepped["embedding"].shape[1]
    # TODO(synk): embedding gather + positional encoding stay in XLA glue
    # (single gather), not inside the Pallas kernel.
    x = jnp.take(prepped["embedding"], src.T, axis=0)        # [B, S, D]
    x = x + positional_encoding(S, D)[None, :, :]
    logits_pad = fused_transformer_stack(x, prepped, nhead)  # [B, 1, NC_PAD]
    return logits_pad.reshape(B, -1)[:, :nclass]


# ------------------------ param init & one-time repack ------------------------

def init_params(key, vocab, nemb, nhead, nhid, nlayer, nclass):
    # PyTorch-layout parameters (weights are [out_features, in_features]).
    scale = 0.2
    keys = jax.random.split(key, 2 + nlayer)

    def uni(k, shape):
        return jax.random.uniform(k, shape, jnp.float32, -scale, scale)

    params = {
        "embedding": uni(keys[0], (vocab, nemb)),
        "dec_w": uni(keys[1], (nclass, nemb)),
        "dec_b": jnp.zeros((nclass,), jnp.float32),
        "layers": [],
    }
    for l in range(nlayer):
        lk = jax.random.split(keys[2 + l], 4)
        params["layers"].append({
            "in_proj_w": uni(lk[0], (3 * nemb, nemb)),
            "in_proj_b": jnp.zeros((3 * nemb,), jnp.float32),
            "out_proj_w": uni(lk[1], (nemb, nemb)),
            "out_proj_b": jnp.zeros((nemb,), jnp.float32),
            "w1": uni(lk[2], (nhid, nemb)),
            "b1": jnp.zeros((nhid,), jnp.float32),
            "w2": uni(lk[3], (nemb, nhid)),
            "b2": jnp.zeros((nemb,), jnp.float32),
            "ln1_g": jnp.ones((nemb,), jnp.float32),
            "ln1_b": jnp.zeros((nemb,), jnp.float32),
            "ln2_g": jnp.ones((nemb,), jnp.float32),
            "ln2_b": jnp.zeros((nemb,), jnp.float32),
        })
    return params


def prepare_params(params, nhead):
    """One-time repack: stack per-layer params on a leading layer axis, fold
    the attention scale into the Q rows, pre-cast matmul weights to bf16, and
    zero-pad the decoder to a lane-dense (128-multiple) output width."""
    D = params["embedding"].shape[1]
    hd = D // nhead
    layers = params["layers"]
    L = len(layers)
    att_scale = 1.0 / math.sqrt(hd)

    def stk(name):
        return jnp.stack([p[name] for p in layers], axis=0)

    # Fold 1/sqrt(hd) into the Q rows of the fused in-proj weight and bias.
    qscale = jnp.concatenate([jnp.full((D,), att_scale, jnp.float32),
                              jnp.ones((2 * D,), jnp.float32)])
    wqkv = stk("in_proj_w") * qscale[None, :, None]          # [L, 3D, D]
    bqkv = stk("in_proj_b") * qscale[None, :]                # [L, 3D]

    nclass = params["dec_w"].shape[0]
    nc_pad = ((nclass + 127) // 128) * 128
    dec_w_pad = jnp.zeros((nc_pad, D), jnp.float32).at[:nclass].set(params["dec_w"])
    dec_b_pad = jnp.zeros((1, nc_pad), jnp.float32).at[0, :nclass].set(params["dec_b"])

    nhid = layers[0]["w1"].shape[0]
    return {
        "embedding": params["embedding"],
        "wqkv": wqkv.astype(MXU_DTYPE),                      # [L, 3D, D] bf16
        "bqkv": bqkv.reshape(L, 1, 3 * D),                   # f32
        "wout": stk("out_proj_w").astype(MXU_DTYPE),         # [L, D, D] bf16
        "bout": stk("out_proj_b").reshape(L, 1, D),
        "ln1_g": stk("ln1_g").reshape(L, 1, D),
        "ln1_b": stk("ln1_b").reshape(L, 1, D),
        "w1": stk("w1").astype(MXU_DTYPE),                   # [L, nhid, D] bf16
        "b1": stk("b1").reshape(L, 1, nhid),
        "w2": stk("w2").astype(MXU_DTYPE),                   # [L, D, nhid] bf16
        "b2": stk("b2").reshape(L, 1, D),
        "ln2_g": stk("ln2_g").reshape(L, 1, D),
        "ln2_b": stk("ln2_b").reshape(L, 1, D),
        "dec_w": dec_w_pad.astype(MXU_DTYPE),                # [NC_PAD, D] bf16
        "dec_b": dec_b_pad,                                  # [1, NC_PAD] f32
    }


# --------------------------------- main ---------------------------------------

if __name__ == "__main__":
    vocab, nemb, nhead, nhid, nlayer, nclass = 50, 32, 4, 64, 2, 5
    S, B = 8, 2

    key = jax.random.PRNGKey(0)
    pkey, skey = jax.random.split(key)
    params = init_params(pkey, vocab, nemb, nhead, nhid, nlayer, nclass)
    prepped = prepare_params(params, nhead)                  # one-time repack
    src = jax.random.randint(skey, (S, B), 0, vocab, dtype=jnp.int32)
    hidden_state = jnp.zeros((1, B, nhid), jnp.float32)      # unused by forward

    fwd = jax.jit(functools.partial(transformer_forward, nhead=nhead, nclass=nclass))
    out = fwd(prepped, src, hidden_state)
    jax.block_until_ready(out)
    assert out.shape == (B, nclass), out.shape
    print("KERNEL_OK")
</pallas_src>

<mosaic_0001>
module attributes {stable_mosaic.version = 11 : i64} {
  func.func @transformer_stack_kernel(%arg0: i32, %arg1: i32, %arg2: memref<1x8x32xf32, #tpu.memory_space<vmem>>, %arg3: memref<1x96x32xbf16, #tpu.memory_space<vmem>>, %arg4: memref<1x1x96xf32, #tpu.memory_space<vmem>>, %arg5: memref<1x32x32xbf16, #tpu.memory_space<vmem>>, %arg6: memref<1x1x32xf32, #tpu.memory_space<vmem>>, %arg7: memref<1x1x32xf32, #tpu.memory_space<vmem>>, %arg8: memref<1x1x32xf32, #tpu.memory_space<vmem>>, %arg9: memref<1x64x32xbf16, #tpu.memory_space<vmem>>, %arg10: memref<1x1x64xf32, #tpu.memory_space<vmem>>, %arg11: memref<1x32x64xbf16, #tpu.memory_space<vmem>>, %arg12: memref<1x1x32xf32, #tpu.memory_space<vmem>>, %arg13: memref<1x1x32xf32, #tpu.memory_space<vmem>>, %arg14: memref<1x1x32xf32, #tpu.memory_space<vmem>>, %arg15: memref<128x32xbf16, #tpu.memory_space<vmem>>, %arg16: memref<1x128xf32, #tpu.memory_space<vmem>>, %arg17: memref<1x1x128xf32, #tpu.memory_space<vmem>>, %arg18: memref<8x32xf32, #tpu.memory_space<vmem>>, %arg19: memref<8x96xbf16, #tpu.memory_space<vmem>>, %arg20: memref<3x4x8x8xbf16, #tpu.memory_space<vmem>>, %arg21: memref<8x32xbf16, #tpu.memory_space<vmem>>) attributes {dimension_semantics = [#tpu.dimension_semantics<parallel>, #tpu.dimension_semantics<arbitrary>], iteration_bounds = array<i64: 2, 2>, scalar_prefetch = 0 : i64, scratch_operands = 4 : i64, tpu.core_type = #tpu.core_type<tc>, window_params = [{transform_indices = @transform_0, window_bounds = array<i64: 1, 8, 32>}, {transform_indices = @transform_1, window_bounds = array<i64: 1, 96, 32>}, {transform_indices = @transform_2, window_bounds = array<i64: 1, 1, 96>}, {transform_indices = @transform_3, window_bounds = array<i64: 1, 32, 32>}, {transform_indices = @transform_4, window_bounds = array<i64: 1, 1, 32>}, {transform_indices = @transform_5, window_bounds = array<i64: 1, 1, 32>}, {transform_indices = @transform_6, window_bounds = array<i64: 1, 1, 32>}, {transform_indices = @transform_7, window_bounds = array<i64: 1, 64, 32>}, {transform_indices = @transform_8, window_bounds = array<i64: 1, 1, 64>}, {transform_indices = @transform_9, window_bounds = array<i64: 1, 32, 64>}, {transform_indices = @transform_10, window_bounds = array<i64: 1, 1, 32>}, {transform_indices = @transform_11, window_bounds = array<i64: 1, 1, 32>}, {transform_indices = @transform_12, window_bounds = array<i64: 1, 1, 32>}, {pipeline_mode = #tpu.pipeline_mode<synchronous>, transform_indices = @transform_13, window_bounds = array<i64: 128, 32>}, {pipeline_mode = #tpu.pipeline_mode<synchronous>, transform_indices = @transform_14, window_bounds = array<i64: 1, 128>}, {transform_indices = @transform_15, window_bounds = array<i64: 1, 1, 128>}]} {
    %c0_i32 = arith.constant 0 : i32
    %0 = arith.cmpi eq, %arg1, %c0_i32 : i32
    %1 = arith.extui %0 : i1 to i32
    %c0_i32_0 = arith.constant 0 : i32
    %2 = arith.cmpi ne, %1, %c0_i32_0 : i32
    scf.if %2 {
      %c0_141 = arith.constant 0 : index
      %c0_142 = arith.constant 0 : index
      %c0_143 = arith.constant 0 : index
      %181 = vector.load %arg2[%c0_141, %c0_142, %c0_143] : memref<1x8x32xf32, #tpu.memory_space<vmem>>, vector<1x8x32xf32>
      %182 = vector.shape_cast %181 : vector<1x8x32xf32> to vector<8x32xf32>
      %c0_144 = arith.constant 0 : index
      %c0_145 = arith.constant 0 : index
      %183 = vector.load %arg18[%c0_144, %c0_145] : memref<8x32xf32, #tpu.memory_space<vmem>>, vector<8x32xf32>
      tpu.vector_store %arg18[%c0_144, %c0_145], %182 {strides = array<i32>} : memref<8x32xf32, #tpu.memory_space<vmem>>, vector<8x32xf32>,
    } else {
    }
    %c0 = arith.constant 0 : index
    %c0_1 = arith.constant 0 : index
    %3 = vector.load %arg18[%c0, %c0_1] : memref<8x32xf32, #tpu.memory_space<vmem>>, vector<8x32xf32>
    %4 = arith.truncf %3 : vector<8x32xf32> to vector<8x32xbf16>
    %c0_2 = arith.constant 0 : index
    %c0_3 = arith.constant 0 : index
    %c0_4 = arith.constant 0 : index
    %5 = vector.load %arg3[%c0_2, %c0_3, %c0_4] : memref<1x96x32xbf16, #tpu.memory_space<vmem>>, vector<1x96x32xbf16>
    %6 = vector.shape_cast %5 : vector<1x96x32xbf16> to vector<96x32xbf16>
    %cst = arith.constant dense<0.000000e+00> : vector<8x96xf32>
    %7 = tpu.matmul %4, %6, %cst {dimension_numbers = #tpu.dot_dimension_numbers<[1], [1], [0], [0], [0, 0, 1, 0], [], []>} : vector<8x32xbf16>, vector<96x32xbf16>, vector<8x96xf32> -> vector<8x96xf32>
    %c0_5 = arith.constant 0 : index
    %c0_6 = arith.constant 0 : index
    %c0_7 = arith.constant 0 : index
    %8 = vector.load %arg4[%c0_5, %c0_6, %c0_7] : memref<1x1x96xf32, #tpu.memory_space<vmem>>, vector<1x1x96xf32>
    %9 = vector.shape_cast %8 : vector<1x1x96xf32> to vector<1x96xf32>
    %10 = vector.broadcast %9 : vector<1x96xf32> to vector<8x96xf32>
    %11 = arith.addf %7, %10 : vector<8x96xf32>
    %12 = arith.truncf %11 : vector<8x96xf32> to vector<8x96xbf16>
    %c0_8 = arith.constant 0 : index
    %c0_9 = arith.constant 0 : index
    %13 = vector.load %arg19[%c0_8, %c0_9] : memref<8x96xbf16, #tpu.memory_space<vmem>>, vector<8x96xbf16>
    tpu.vector_store %arg19[%c0_8, %c0_9], %12 {strides = array<i32>} : memref<8x96xbf16, #tpu.memory_space<vmem>>, vector<8x96xbf16>,
    %c0_10 = arith.constant 0 : index
    %c0_11 = arith.constant 0 : index
    %14 = vector.load %arg19[%c0_10, %c0_11] : memref<8x96xbf16, #tpu.memory_space<vmem>>, vector<8x8xbf16>
    %c0_12 = arith.constant 0 : index
    %c0_13 = arith.constant 0 : index
    %c0_14 = arith.constant 0 : index
    %c0_15 = arith.constant 0 : index
    %15 = vector.load %arg20[%c0_12, %c0_13, %c0_14, %c0_15] : memref<3x4x8x8xbf16, #tpu.memory_space<vmem>>, vector<1x1x8x8xbf16>
    %16 = vector.shape_cast %15 : vector<1x1x8x8xbf16> to vector<8x8xbf16>
    %17 = vector.shape_cast %14 : vector<8x8xbf16> to vector<1x1x8x8xbf16>
    tpu.vector_store %arg20[%c0_12, %c0_13, %c0_14, %c0_15], %17 {strides = array<i32>} : memref<3x4x8x8xbf16, #tpu.memory_space<vmem>>, vector<1x1x8x8xbf16>,
    %c0_16 = arith.constant 0 : index
    %c8 = arith.constant 8 : index
    %18 = vector.load %arg19[%c0_16, %c8] : memref<8x96xbf16, #tpu.memory_space<vmem>>, vector<8x8xbf16>
    %c0_17 = arith.constant 0 : index
    %c1 = arith.constant 1 : index
    %c0_18 = arith.constant 0 : index
    %c0_19 = arith.constant 0 : index
    %19 = vector.load %arg20[%c0_17, %c1, %c0_18, %c0_19] : memref<3x4x8x8xbf16, #tpu.memory_space<vmem>>, vector<1x1x8x8xbf16>
    %20 = vector.shape_cast %19 : vector<1x1x8x8xbf16> to vector<8x8xbf16>
    %21 = vector.shape_cast %18 : vector<8x8xbf16> to vector<1x1x8x8xbf16>
    tpu.vector_store %arg20[%c0_17, %c1, %c0_18, %c0_19], %21 {strides = array<i32>} : memref<3x4x8x8xbf16, #tpu.memory_space<vmem>>, vector<1x1x8x8xbf16>,
    %c0_20 = arith.constant 0 : index
    %c16 = arith.constant 16 : index
    %22 = vector.load %arg19[%c0_20, %c16] : memref<8x96xbf16, #tpu.memory_space<vmem>>, vector<8x8xbf16>
    %c0_21 = arith.constant 0 : index
    %c2 = arith.constant 2 : index
    %c0_22 = arith.constant 0 : index
    %c0_23 = arith.constant 0 : index
    %23 = vector.load %arg20[%c0_21, %c2, %c0_22, %c0_23] : memref<3x4x8x8xbf16, #tpu.memory_space<vmem>>, vector<1x1x8x8xbf16>
    %24 = vector.shape_cast %23 : vector<1x1x8x8xbf16> to vector<8x8xbf16>
    %25 = vector.shape_cast %22 : vector<8x8xbf16> to vector<1x1x8x8xbf16>
    tpu.vector_store %arg20[%c0_21, %c2, %c0_22, %c0_23], %25 {strides = array<i32>} : memref<3x4x8x8xbf16, #tpu.memory_space<vmem>>, vector<1x1x8x8xbf16>,
    %c0_24 = arith.constant 0 : index
    %c24 = arith.constant 24 : index
    %26 = vector.load %arg19[%c0_24, %c24] : memref<8x96xbf16, #tpu.memory_space<vmem>>, vector<8x8xbf16>
    %c0_25 = arith.constant 0 : index
    %c3 = arith.constant 3 : index
    %c0_26 = arith.constant 0 : index
    %c0_27 = arith.constant 0 : index
    %27 = vector.load %arg20[%c0_25, %c3, %c0_26, %c0_27] : memref<3x4x8x8xbf16, #tpu.memory_space<vmem>>, vector<1x1x8x8xbf16>
    %28 = vector.shape_cast %27 : vector<1x1x8x8xbf16> to vector<8x8xbf16>
    %29 = vector.shape_cast %26 : vector<8x8xbf16> to vector<1x1x8x8xbf16>
    tpu.vector_store %arg20[%c0_25, %c3, %c0_26, %c0_27], %29 {strides = array<i32>} : memref<3x4x8x8xbf16, #tpu.memory_space<vmem>>, vector<1x1x8x8xbf16>,
    %c0_28 = arith.constant 0 : index
    %c32 = arith.constant 32 : index
    %30 = vector.load %arg19[%c0_28, %c32] : memref<8x96xbf16, #tpu.memory_space<vmem>>, vector<8x8xbf16>
    %c1_29 = arith.constant 1 : index
    %c0_30 = arith.constant 0 : index
    %c0_31 = arith.constant 0 : index
    %c0_32 = arith.constant 0 : index
    %31 = vector.load %arg20[%c1_29, %c0_30, %c0_31, %c0_32] : memref<3x4x8x8xbf16, #tpu.memory_space<vmem>>, vector<1x1x8x8xbf16>
    %32 = vector.shape_cast %31 : vector<1x1x8x8xbf16> to vector<8x8xbf16>
    %33 = vector.shape_cast %30 : vector<8x8xbf16> to vector<1x1x8x8xbf16>
    tpu.vector_store %arg20[%c1_29, %c0_30, %c0_31, %c0_32], %33 {strides = array<i32>} : memref<3x4x8x8xbf16, #tpu.memory_space<vmem>>, vector<1x1x8x8xbf16>,
    %c0_33 = arith.constant 0 : index
    %c40 = arith.constant 40 : index
    %34 = vector.load %arg19[%c0_33, %c40] : memref<8x96xbf16, #tpu.memory_space<vmem>>, vector<8x8xbf16>
    %c1_34 = arith.constant 1 : index
    %c1_35 = arith.constant 1 : index
    %c0_36 = arith.constant 0 : index
    %c0_37 = arith.constant 0 : index
    %35 = vector.load %arg20[%c1_34, %c1_35, %c0_36, %c0_37] : memref<3x4x8x8xbf16, #tpu.memory_space<vmem>>, vector<1x1x8x8xbf16>
    %36 = vector.shape_cast %35 : vector<1x1x8x8xbf16> to vector<8x8xbf16>
    %37 = vector.shape_cast %34 : vector<8x8xbf16> to vector<1x1x8x8xbf16>
    tpu.vector_store %arg20[%c1_34, %c1_35, %c0_36, %c0_37], %37 {strides = array<i32>} : memref<3x4x8x8xbf16, #tpu.memory_space<vmem>>, vector<1x1x8x8xbf16>,
    %c0_38 = arith.constant 0 : index
    %c48 = arith.constant 48 : index
    %38 = vector.load %arg19[%c0_38, %c48] : memref<8x96xbf16, #tpu.memory_space<vmem>>, vector<8x8xbf16>
    %c1_39 = arith.constant 1 : index
    %c2_40 = arith.constant 2 : index
    %c0_41 = arith.constant 0 : index
    %c0_42 = arith.constant 0 : index
    %39 = vector.load %arg20[%c1_39, %c2_40, %c0_41, %c0_42] : memref<3x4x8x8xbf16, #tpu.memory_space<vmem>>, vector<1x1x8x8xbf16>
    %40 = vector.shape_cast %39 : vector<1x1x8x8xbf16> to vector<8x8xbf16>
    %41 = vector.shape_cast %38 : vector<8x8xbf16> to vector<1x1x8x8xbf16>
    tpu.vector_store %arg20[%c1_39, %c2_40, %c0_41, %c0_42], %41 {strides = array<i32>} : memref<3x4x8x8xbf16, #tpu.memory_space<vmem>>, vector<1x1x8x8xbf16>,
    %c0_43 = arith.constant 0 : index
    %c56 = arith.constant 56 : index
    %42 = vector.load %arg19[%c0_43, %c56] : memref<8x96xbf16, #tpu.memory_space<vmem>>, vector<8x8xbf16>
    %c1_44 = arith.constant 1 : index
    %c3_45 = arith.constant 3 : index
    %c0_46 = arith.constant 0 : index
    %c0_47 = arith.constant 0 : index
    %43 = vector.load %arg20[%c1_44, %c3_45, %c0_46, %c0_47] : memref<3x4x8x8xbf16, #tpu.memory_space<vmem>>, vector<1x1x8x8xbf16>
    %44 = vector.shape_cast %43 : vector<1x1x8x8xbf16> to vector<8x8xbf16>
    %45 = vector.shape_cast %42 : vector<8x8xbf16> to vector<1x1x8x8xbf16>
    tpu.vector_store %arg20[%c1_44, %c3_45, %c0_46, %c0_47], %45 {strides = array<i32>} : memref<3x4x8x8xbf16, #tpu.memory_space<vmem>>, vector<1x1x8x8xbf16>,
    %c0_48 = arith.constant 0 : index
    %c64 = arith.constant 64 : index
    %46 = vector.load %arg19[%c0_48, %c64] : memref<8x96xbf16, #tpu.memory_space<vmem>>, vector<8x8xbf16>
    %c2_49 = arith.constant 2 : index
    %c0_50 = arith.constant 0 : index
    %c0_51 = arith.constant 0 : index
    %c0_52 = arith.constant 0 : index
    %47 = vector.load %arg20[%c2_49, %c0_50, %c0_51, %c0_52] : memref<3x4x8x8xbf16, #tpu.memory_space<vmem>>, vector<1x1x8x8xbf16>
    %48 = vector.shape_cast %47 : vector<1x1x8x8xbf16> to vector<8x8xbf16>
    %49 = vector.shape_cast %46 : vector<8x8xbf16> to vector<1x1x8x8xbf16>
    tpu.vector_store %arg20[%c2_49, %c0_50, %c0_51, %c0_52], %49 {strides = array<i32>} : memref<3x4x8x8xbf16, #tpu.memory_space<vmem>>, vector<1x1x8x8xbf16>,
    %c0_53 = arith.constant 0 : index
    %c72 = arith.constant 72 : index
    %50 = vector.load %arg19[%c0_53, %c72] : memref<8x96xbf16, #tpu.memory_space<vmem>>, vector<8x8xbf16>
    %c2_54 = arith.constant 2 : index
    %c1_55 = arith.constant 1 : index
    %c0_56 = arith.constant 0 : index
    %c0_57 = arith.constant 0 : index
    %51 = vector.load %arg20[%c2_54, %c1_55, %c0_56, %c0_57] : memref<3x4x8x8xbf16, #tpu.memory_space<vmem>>, vector<1x1x8x8xbf16>
    %52 = vector.shape_cast %51 : vector<1x1x8x8xbf16> to vector<8x8xbf16>
    %53 = vector.shape_cast %50 : vector<8x8xbf16> to vector<1x1x8x8xbf16>
    tpu.vector_store %arg20[%c2_54, %c1_55, %c0_56, %c0_57], %53 {strides = array<i32>} : memref<3x4x8x8xbf16, #tpu.memory_space<vmem>>, vector<1x1x8x8xbf16>,
    %c0_58 = arith.constant 0 : index
    %c80 = arith.constant 80 : index
    %54 = vector.load %arg19[%c0_58, %c80] : memref<8x96xbf16, #tpu.memory_space<vmem>>, vector<8x8xbf16>
    %c2_59 = arith.constant 2 : index
    %c2_60 = arith.constant 2 : index
    %c0_61 = arith.constant 0 : index
    %c0_62 = arith.constant 0 : index
    %55 = vector.load %arg20[%c2_59, %c2_60, %c0_61, %c0_62] : memref<3x4x8x8xbf16, #tpu.memory_space<vmem>>, vector<1x1x8x8xbf16>
    %56 = vector.shape_cast %55 : vector<1x1x8x8xbf16> to vector<8x8xbf16>
    %57 = vector.shape_cast %54 : vector<8x8xbf16> to vector<1x1x8x8xbf16>
    tpu.vector_store %arg20[%c2_59, %c2_60, %c0_61, %c0_62], %57 {strides = array<i32>} : memref<3x4x8x8xbf16, #tpu.memory_space<vmem>>, vector<1x1x8x8xbf16>,
    %c0_63 = arith.constant 0 : index
    %c88 = arith.constant 88 : index
    %58 = vector.load %arg19[%c0_63, %c88] : memref<8x96xbf16, #tpu.memory_space<vmem>>, vector<8x8xbf16>
    %c2_64 = arith.constant 2 : index
    %c3_65 = arith.constant 3 : index
    %c0_66 = arith.constant 0 : index
    %c0_67 = arith.constant 0 : index
    %59 = vector.load %arg20[%c2_64, %c3_65, %c0_66, %c0_67] : memref<3x4x8x8xbf16, #tpu.memory_space<vmem>>, vector<1x1x8x8xbf16>
    %60 = vector.shape_cast %59 : vector<1x1x8x8xbf16> to vector<8x8xbf16>
    %61 = vector.shape_cast %58 : vector<8x8xbf16> to vector<1x1x8x8xbf16>
    tpu.vector_store %arg20[%c2_64, %c3_65, %c0_66, %c0_67], %61 {strides = array<i32>} : memref<3x4x8x8xbf16, #tpu.memory_space<vmem>>, vector<1x1x8x8xbf16>,
    %c0_68 = arith.constant 0 : index
    %c0_69 = arith.constant 0 : index
    %c0_70 = arith.constant 0 : index
    %c0_71 = arith.constant 0 : index
    %62 = vector.load %arg20[%c0_68, %c0_69, %c0_70, %c0_71] : memref<3x4x8x8xbf16, #tpu.memory_space<vmem>>, vector<1x4x8x8xbf16>
    %63 = vector.shape_cast %62 : vector<1x4x8x8xbf16> to vector<4x8x8xbf16>
    %c1_72 = arith.constant 1 : index
    %c0_73 = arith.constant 0 : index
    %c0_74 = arith.constant 0 : index
    %c0_75 = arith.constant 0 : index
    %64 = vector.load %arg20[%c1_72, %c0_73, %c0_74, %c0_75] : memref<3x4x8x8xbf16, #tpu.memory_space<vmem>>, vector<1x4x8x8xbf16>
    %65 = vector.shape_cast %64 : vector<1x4x8x8xbf16> to vector<4x8x8xbf16>
    %c2_76 = arith.constant 2 : index
    %c0_77 = arith.constant 0 : index
    %c0_78 = arith.constant 0 : index
    %c0_79 = arith.constant 0 : index
    %66 = vector.load %arg20[%c2_76, %c0_77, %c0_78, %c0_79] : memref<3x4x8x8xbf16, #tpu.memory_space<vmem>>, vector<1x4x8x8xbf16>
    %67 = vector.shape_cast %66 : vector<1x4x8x8xbf16> to vector<4x8x8xbf16>
    "tpu.trace_start"() <{level = 10 : i32, message = "hqd,hkd->hqk"}> : () -> ()
    %cst_80 = arith.constant dense<0.000000e+00> : vector<4x8x8xf32>
    %68 = tpu.matmul %63, %65, %cst_80 {dimension_numbers = #tpu.dot_dimension_numbers<[2], [2], [1], [1], [0, 0, 0, 1, 1, 1], [0], [0]>} : vector<4x8x8xbf16>, vector<4x8x8xbf16>, vector<4x8x8xf32> -> vector<4x8x8xf32>
    "tpu.trace_stop"() : () -> ()
    %cst_81 = arith.constant dense<0xFF800000> : vector<4x8xf32>
    %69 = vector.multi_reduction <maximumf>, %68, %cst_81 [2] : vector<4x8x8xf32> to vector<4x8xf32>
    %70 = vector.shape_cast %69 : vector<4x8xf32> to vector<4x8x1xf32>
    %71 = vector.broadcast %70 : vector<4x8x1xf32> to vector<4x8x8xf32>
    %72 = arith.subf %68, %71 : vector<4x8x8xf32>
    %73 = math.exp %72 : vector<4x8x8xf32>
    %cst_82 = arith.constant dense<0.000000e+00> : vector<4x8xf32>
    %74 = vector.multi_reduction <add>, %73, %cst_82 [2] : vector<4x8x8xf32> to vector<4x8xf32>
    %75 = vector.shape_cast %74 : vector<4x8xf32> to vector<4x8x1xf32>
    %76 = tpu.reciprocal %75 {approx = true} : vector<4x8x1xf32> -> vector<4x8x1xf32>
    %77 = vector.broadcast %76 : vector<4x8x1xf32> to vector<4x8x8xf32>
    %78 = arith.mulf %73, %77 : vector<4x8x8xf32>
    %79 = arith.truncf %78 : vector<4x8x8xf32> to vector<4x8x8xbf16>
    "tpu.trace_start"() <{level = 10 : i32, message = "hqk,hkd->hqd"}> : () -> ()
    %cst_83 = arith.constant dense<0.000000e+00> : vector<4x8x8xf32>
    %80 = tpu.matmul %79, %67, %cst_83 {dimension_numbers = #tpu.dot_dimension_numbers<[2], [1], [1], [2], [0, 0, 0, 1, 1, 2], [0], [0]>} : vector<4x8x8xbf16>, vector<4x8x8xbf16>, vector<4x8x8xf32> -> vector<4x8x8xf32>
    "tpu.trace_stop"() : () -> ()
    %81 = vector.extract_strided_slice %80 {offsets = [0, 0, 0], sizes = [1, 8, 8], strides = [1, 1, 1]} : vector<4x8x8xf32> to vector<1x8x8xf32>
    %82 = vector.shape_cast %81 : vector<1x8x8xf32> to vector<8x8xf32>
    %83 = arith.truncf %82 : vector<8x8xf32> to vector<8x8xbf16>
    %c0_84 = arith.constant 0 : index
    %c0_85 = arith.constant 0 : index
    %84 = vector.load %arg21[%c0_84, %c0_85] : memref<8x32xbf16, #tpu.memory_space<vmem>>, vector<8x8xbf16>
    tpu.vector_store %arg21[%c0_84, %c0_85], %83 {strides = array<i32>} : memref<8x32xbf16, #tpu.memory_space<vmem>>, vector<8x8xbf16>,
    %85 = vector.extract_strided_slice %80 {offsets = [1, 0, 0], sizes = [1, 8, 8], strides = [1, 1, 1]} : vector<4x8x8xf32> to vector<1x8x8xf32>
    %86 = vector.shape_cast %85 : vector<1x8x8xf32> to vector<8x8xf32>
    %87 = arith.truncf %86 : vector<8x8xf32> to vector<8x8xbf16>
    %c0_86 = arith.constant 0 : index
    %c8_87 = arith.constant 8 : index
    %88 = vector.load %arg21[%c0_86, %c8_87] : memref<8x32xbf16, #tpu.memory_space<vmem>>, vector<8x8xbf16>
    tpu.vector_store %arg21[%c0_86, %c8_87], %87 {strides = array<i32>} : memref<8x32xbf16, #tpu.memory_space<vmem>>, vector<8x8xbf16>,
    %89 = vector.extract_strided_slice %80 {offsets = [2, 0, 0], sizes = [1, 8, 8], strides = [1, 1, 1]} : vector<4x8x8xf32> to vector<1x8x8xf32>
    %90 = vector.shape_cast %89 : vector<1x8x8xf32> to vector<8x8xf32>
    %91 = arith.truncf %90 : vector<8x8xf32> to vector<8x8xbf16>
    %c0_88 = arith.constant 0 : index
    %c16_89 = arith.constant 16 : index
    %92 = vector.load %arg21[%c0_88, %c16_89] : memref<8x32xbf16, #tpu.memory_space<vmem>>, vector<8x8xbf16>
    tpu.vector_store %arg21[%c0_88, %c16_89], %91 {strides = array<i32>} : memref<8x32xbf16, #tpu.memory_space<vmem>>, vector<8x8xbf16>,
    %93 = vector.extract_strided_slice %80 {offsets = [3, 0, 0], sizes = [1, 8, 8], strides = [1, 1, 1]} : vector<4x8x8xf32> to vector<1x8x8xf32>
    %94 = vector.shape_cast %93 : vector<1x8x8xf32> to vector<8x8xf32>
    %95 = arith.truncf %94 : vector<8x8xf32> to vector<8x8xbf16>
    %c0_90 = arith.constant 0 : index
    %c24_91 = arith.constant 24 : index
    %96 = vector.load %arg21[%c0_90, %c24_91] : memref<8x32xbf16, #tpu.memory_space<vmem>>, vector<8x8xbf16>
    tpu.vector_store %arg21[%c0_90, %c24_91], %95 {strides = array<i32>} : memref<8x32xbf16, #tpu.memory_space<vmem>>, vector<8x8xbf16>,
    %c0_92 = arith.constant 0 : index
    %c0_93 = arith.constant 0 : index
    %97 = vector.load %arg21[%c0_92, %c0_93] : memref<8x32xbf16, #tpu.memory_space<vmem>>, vector<8x32xbf16>
    %c0_94 = arith.constant 0 : index
    %c0_95 = arith.constant 0 : index
    %c0_96 = arith.constant 0 : index
    %98 = vector.load %arg5[%c0_94, %c0_95, %c0_96] : memref<1x32x32xbf16, #tpu.memory_space<vmem>>, vector<1x32x32xbf16>
    %99 = vector.shape_cast %98 : vector<1x32x32xbf16> to vector<32x32xbf16>
    %cst_97 = arith.constant dense<0.000000e+00> : vector<8x32xf32>
    %100 = tpu.matmul %97, %99, %cst_97 {dimension_numbers = #tpu.dot_dimension_numbers<[1], [1], [0], [0], [0, 0, 1, 0], [], []>} : vector<8x32xbf16>, vector<32x32xbf16>, vector<8x32xf32> -> vector<8x32xf32>
    %c0_98 = arith.constant 0 : index
    %c0_99 = arith.constant 0 : index
    %c0_100 = arith.constant 0 : index
    %101 = vector.load %arg6[%c0_98, %c0_99, %c0_100] : memref<1x1x32xf32, #tpu.memory_space<vmem>>, vector<1x1x32xf32>
    %102 = vector.shape_cast %101 : vector<1x1x32xf32> to vector<1x32xf32>
    %103 = vector.broadcast %102 : vector<1x32xf32> to vector<8x32xf32>
    %104 = arith.addf %100, %103 : vector<8x32xf32>
    %105 = arith.addf %3, %104 : vector<8x32xf32>
    %c0_101 = arith.constant 0 : index
    %c0_102 = arith.constant 0 : index
    %c0_103 = arith.constant 0 : index
    %106 = vector.load %arg7[%c0_101, %c0_102, %c0_103] : memref<1x1x32xf32, #tpu.memory_space<vmem>>, vector<1x1x32xf32>
    %107 = vector.shape_cast %106 : vector<1x1x32xf32> to vector<1x32xf32>
    %c0_104 = arith.constant 0 : index
    %c0_105 = arith.constant 0 : index
    %c0_106 = arith.constant 0 : index
    %108 = vector.load %arg8[%c0_104, %c0_105, %c0_106] : memref<1x1x32xf32, #tpu.memory_space<vmem>>, vector<1x1x32xf32>
    %109 = vector.shape_cast %108 : vector<1x1x32xf32> to vector<1x32xf32>
    %cst_107 = arith.constant dense<0.000000e+00> : vector<8xf32>
    %110 = vector.multi_reduction <add>, %105, %cst_107 [1] : vector<8x32xf32> to vector<8xf32>
    %111 = vector.shape_cast %110 : vector<8xf32> to vector<8x1xf32>
    %cst_108 = arith.constant 3.200000e+01 : f32
    %112 = vector.broadcast %cst_108 : f32 to vector<8x1xf32>
    %113 = arith.divf %111, %112 : vector<8x1xf32>
    %114 = vector.broadcast %113 : vector<8x1xf32> to vector<8x32xf32>
    %115 = arith.subf %105, %114 : vector<8x32xf32>
    %116 = arith.mulf %115, %115 : vector<8x32xf32>
    %cst_109 = arith.constant dense<0.000000e+00> : vector<8xf32>
    %117 = vector.multi_reduction <add>, %116, %cst_109 [1] : vector<8x32xf32> to vector<8xf32>
    %118 = vector.shape_cast %117 : vector<8xf32> to vector<8x1xf32>
    %cst_110 = arith.constant 3.200000e+01 : f32
    %119 = vector.broadcast %cst_110 : f32 to vector<8x1xf32>
    %120 = arith.divf %118, %119 : vector<8x1xf32>
    %121 = vector.broadcast %113 : vector<8x1xf32> to vector<8x32xf32>
    %122 = arith.subf %105, %121 : vector<8x32xf32>
    %cst_111 = arith.constant 9.99999974E-6 : f32
    %123 = vector.broadcast %cst_111 : f32 to vector<8x1xf32>
    %124 = arith.addf %120, %123 : vector<8x1xf32>
    %125 = math.rsqrt %124 : vector<8x1xf32>
    %126 = vector.broadcast %125 : vector<8x1xf32> to vector<8x32xf32>
    %127 = arith.mulf %122, %126 : vector<8x32xf32>
    %128 = vector.broadcast %107 : vector<1x32xf32> to vector<8x32xf32>
    %129 = arith.mulf %127, %128 : vector<8x32xf32>
    %130 = vector.broadcast %109 : vector<1x32xf32> to vector<8x32xf32>
    %131 = arith.addf %129, %130 : vector<8x32xf32>
    %132 = arith.truncf %131 : vector<8x32xf32> to vector<8x32xbf16>
    %c0_112 = arith.constant 0 : index
    %c0_113 = arith.constant 0 : index
    %c0_114 = arith.constant 0 : index
    %133 = vector.load %arg9[%c0_112, %c0_113, %c0_114] : memref<1x64x32xbf16, #tpu.memory_space<vmem>>, vector<1x64x32xbf16>
    %134 = vector.shape_cast %133 : vector<1x64x32xbf16> to vector<64x32xbf16>
    %cst_115 = arith.constant dense<0.000000e+00> : vector<8x64xf32>
    %135 = tpu.matmul %132, %134, %cst_115 {dimension_numbers = #tpu.dot_dimension_numbers<[1], [1], [0], [0], [0, 0, 1, 0], [], []>} : vector<8x32xbf16>, vector<64x32xbf16>, vector<8x64xf32> -> vector<8x64xf32>
    %c0_116 = arith.constant 0 : index
    %c0_117 = arith.constant 0 : index
    %c0_118 = arith.constant 0 : index
    %136 = vector.load %arg10[%c0_116, %c0_117, %c0_118] : memref<1x1x64xf32, #tpu.memory_space<vmem>>, vector<1x1x64xf32>
    %137 = vector.shape_cast %136 : vector<1x1x64xf32> to vector<1x64xf32>
    %138 = vector.broadcast %137 : vector<1x64xf32> to vector<8x64xf32>
    %139 = arith.addf %135, %138 : vector<8x64xf32>
    %cst_119 = arith.constant 0.000000e+00 : f32
    %140 = vector.broadcast %cst_119 : f32 to vector<8x64xf32>
    %141 = arith.maximumf %139, %140 : vector<8x64xf32>
    %142 = arith.truncf %141 : vector<8x64xf32> to vector<8x64xbf16>
    %c0_120 = arith.constant 0 : index
    %c0_121 = arith.constant 0 : index
    %c0_122 = arith.constant 0 : index
    %143 = vector.load %arg11[%c0_120, %c0_121, %c0_122] : memref<1x32x64xbf16, #tpu.memory_space<vmem>>, vector<1x32x64xbf16>
    %144 = vector.shape_cast %143 : vector<1x32x64xbf16> to vector<32x64xbf16>
    %cst_123 = arith.constant dense<0.000000e+00> : vector<8x32xf32>
    %145 = tpu.matmul %142, %144, %cst_123 {dimension_numbers = #tpu.dot_dimension_numbers<[1], [1], [0], [0], [0, 0, 1, 0], [], []>} : vector<8x64xbf16>, vector<32x64xbf16>, vector<8x32xf32> -> vector<8x32xf32>
    %c0_124 = arith.constant 0 : index
    %c0_125 = arith.constant 0 : index
    %c0_126 = arith.constant 0 : index
    %146 = vector.load %arg12[%c0_124, %c0_125, %c0_126] : memref<1x1x32xf32, #tpu.memory_space<vmem>>, vector<1x1x32xf32>
    %147 = vector.shape_cast %146 : vector<1x1x32xf32> to vector<1x32xf32>
    %148 = vector.broadcast %147 : vector<1x32xf32> to vector<8x32xf32>
    %149 = arith.addf %145, %148 : vector<8x32xf32>
    %150 = arith.addf %131, %149 : vector<8x32xf32>
    %c0_127 = arith.constant 0 : index
    %c0_128 = arith.constant 0 : index
    %c0_129 = arith.constant 0 : index
    %151 = vector.load %arg13[%c0_127, %c0_128, %c0_129] : memref<1x1x32xf32, #tpu.memory_space<vmem>>, vector<1x1x32xf32>
    %152 = vector.shape_cast %151 : vector<1x1x32xf32> to vector<1x32xf32>
    %c0_130 = arith.constant 0 : index
    %c0_131 = arith.constant 0 : index
    %c0_132 = arith.constant 0 : index
    %153 = vector.load %arg14[%c0_130, %c0_131, %c0_132] : memref<1x1x32xf32, #tpu.memory_space<vmem>>, vector<1x1x32xf32>
    %154 = vector.shape_cast %153 : vector<1x1x32xf32> to vector<1x32xf32>
    %cst_133 = arith.constant dense<0.000000e+00> : vector<8xf32>
    %155 = vector.multi_reduction <add>, %150, %cst_133 [1] : vector<8x32xf32> to vector<8xf32>
    %156 = vector.shape_cast %155 : vector<8xf32> to vector<8x1xf32>
    %cst_134 = arith.constant 3.200000e+01 : f32
    %157 = vector.broadcast %cst_134 : f32 to vector<8x1xf32>
    %158 = arith.divf %156, %157 : vector<8x1xf32>
    %159 = vector.broadcast %158 : vector<8x1xf32> to vector<8x32xf32>
    %160 = arith.subf %150, %159 : vector<8x32xf32>
    %161 = arith.mulf %160, %160 : vector<8x32xf32>
    %cst_135 = arith.constant dense<0.000000e+00> : vector<8xf32>
    %162 = vector.multi_reduction <add>, %161, %cst_135 [1] : vector<8x32xf32> to vector<8xf32>
    %163 = vector.shape_cast %162 : vector<8xf32> to vector<8x1xf32>
    %cst_136 = arith.constant 3.200000e+01 : f32
    %164 = vector.broadcast %cst_136 : f32 to vector<8x1xf32>
    %165 = arith.divf %163, %164 : vector<8x1xf32>
    %166 = vector.broadcast %158 : vector<8x1xf32> to vector<8x32xf32>
    %167 = arith.subf %150, %166 : vector<8x32xf32>
    %cst_137 = arith.constant 9.99999974E-6 : f32
    %168 = vector.broadcast %cst_137 : f32 to vector<8x1xf32>
    %169 = arith.addf %165, %168 : vector<8x1xf32>
    %170 = math.rsqrt %169 : vector<8x1xf32>
    %171 = vector.broadcast %170 : vector<8x1xf32> to vector<8x32xf32>
    %172 = arith.mulf %167, %171 : vector<8x32xf32>
    %173 = vector.broadcast %152 : vector<1x32xf32> to vector<8x32xf32>
    %174 = arith.mulf %172, %173 : vector<8x32xf32>
    %175 = vector.broadcast %154 : vector<1x32xf32> to vector<8x32xf32>
    %176 = arith.addf %174, %175 : vector<8x32xf32>
    %c0_138 = arith.constant 0 : index
    %c0_139 = arith.constant 0 : index
    %177 = vector.load %arg18[%c0_138, %c0_139] : memref<8x32xf32, #tpu.memory_space<vmem>>, vector<8x32xf32>
    tpu.vector_store %arg18[%c0_138, %c0_139], %176 {strides = array<i32>} : memref<8x32xf32, #tpu.memory_space<vmem>>, vector<8x32xf32>,
    %c1_i32 = arith.constant 1 : i32
    %178 = arith.cmpi eq, %arg1, %c1_i32 : i32
    %179 = arith.extui %178 : i1 to i32
    %c0_i32_140 = arith.constant 0 : i32
    %180 = arith.cmpi ne, %179, %c0_i32_140 : i32
    scf.if %180 {
      %cst_141 = arith.constant dense<0.000000e+00> : vector<32xf32>
      %181 = vector.multi_reduction <add>, %176, %cst_141 [0] : vector<8x32xf32> to vector<32xf32>
      %182 = vector.shape_cast %181 : vector<32xf32> to vector<1x32xf32>
      %cst_142 = arith.constant 8.000000e+00 : f32
      %183 = vector.broadcast %cst_142 : f32 to vector<1x32xf32>
      %184 = arith.divf %182, %183 : vector<1x32xf32>
      %185 = arith.truncf %184 : vector<1x32xf32> to vector<1x32xbf16>
      %c0_143 = arith.constant 0 : index
      %c0_144 = arith.constant 0 : index
      %186 = vector.load %arg15[%c0_143, %c0_144] : memref<128x32xbf16, #tpu.memory_space<vmem>>, vector<128x32xbf16>
      %cst_145 = arith.constant dense<0.000000e+00> : vector<1x128xf32>
      %187 = tpu.matmul %185, %186, %cst_145 {dimension_numbers = #tpu.dot_dimension_numbers<[1], [1], [0], [0], [0, 0, 1, 0], [], []>} : vector<1x32xbf16>, vector<128x32xbf16>, vector<1x128xf32> -> vector<1x128xf32>
      %c0_146 = arith.constant 0 : index
      %c0_147 = arith.constant 0 : index
      %188 = vector.load %arg16[%c0_146, %c0_147] : memref<1x128xf32, #tpu.memory_space<vmem>>, vector<1x128xf32>
      %189 = arith.addf %187, %188 : vector<1x128xf32>
      %190 = vector.shape_cast %189 : vector<1x128xf32> to vector<1x1x128xf32>
      %c0_148 = arith.constant 0 : index
      %c0_149 = arith.constant 0 : index
      %c0_150 = arith.constant 0 : index
      %191 = vector.load %arg17[%c0_148, %c0_149, %c0_150] : memref<1x1x128xf32, #tpu.memory_space<vmem>>, vector<1x1x128xf32>
      tpu.vector_store %arg17[%c0_148, %c0_149, %c0_150], %190 {strides = array<i32>} : memref<1x1x128xf32, #tpu.memory_space<vmem>>, vector<1x1x128xf32>,
    } else {
    }
    return
  }
  func.func @transform_0(%arg0: i32, %arg1: i32) -> (i32, i32, i32) {
    %c0_i32 = arith.constant 0 : i32
    %c0_i32_0 = arith.constant 0 : i32
    %c0_i32_1 = arith.constant 0 : i32
    return %arg0, %c0_i32, %c0_i32_0 : i32, i32, i32
  }
  func.func @transform_1(%arg0: i32, %arg1: i32) -> (i32, i32, i32) {
    %c0_i32 = arith.constant 0 : i32
    %c0_i32_0 = arith.constant 0 : i32
    %c0_i32_1 = arith.constant 0 : i32
    return %arg1, %c0_i32, %c0_i32_0 : i32, i32, i32
  }
  func.func @transform_2(%arg0: i32, %arg1: i32) -> (i32, i32, i32) {
    %c0_i32 = arith.constant 0 : i32
    %c0_i32_0 = arith.constant 0 : i32
    %c0_i32_1 = arith.constant 0 : i32
    return %arg1, %c0_i32, %c0_i32_0 : i32, i32, i32
  }
  func.func @transform_3(%arg0: i32, %arg1: i32) -> (i32, i32, i32) {
    %c0_i32 = arith.constant 0 : i32
    %c0_i32_0 = arith.constant 0 : i32
    %c0_i32_1 = arith.constant 0 : i32
    return %arg1, %c0_i32, %c0_i32_0 : i32, i32, i32
  }
  func.func @transform_4(%arg0: i32, %arg1: i32) -> (i32, i32, i32) {
    %c0_i32 = arith.constant 0 : i32
    %c0_i32_0 = arith.constant 0 : i32
    %c0_i32_1 = arith.constant 0 : i32
    return %arg1, %c0_i32, %c0_i32_0 : i32, i32, i32
  }
  func.func @transform_5(%arg0: i32, %arg1: i32) -> (i32, i32, i32) {
    %c0_i32 = arith.constant 0 : i32
    %c0_i32_0 = arith.constant 0 : i32
    %c0_i32_1 = arith.constant 0 : i32
    return %arg1, %c0_i32, %c0_i32_0 : i32, i32, i32
  }
  func.func @transform_6(%arg0: i32, %arg1: i32) -> (i32, i32, i32) {
    %c0_i32 = arith.constant 0 : i32
    %c0_i32_0 = arith.constant 0 : i32
    %c0_i32_1 = arith.constant 0 : i32
    return %arg1, %c0_i32, %c0_i32_0 : i32, i32, i32
  }
  func.func @transform_7(%arg0: i32, %arg1: i32) -> (i32, i32, i32) {
    %c0_i32 = arith.constant 0 : i32
    %c0_i32_0 = arith.constant 0 : i32
    %c0_i32_1 = arith.constant 0 : i32
    return %arg1, %c0_i32, %c0_i32_0 : i32, i32, i32
  }
  func.func @transform_8(%arg0: i32, %arg1: i32) -> (i32, i32, i32) {
    %c0_i32 = arith.constant 0 : i32
    %c0_i32_0 = arith.constant 0 : i32
    %c0_i32_1 = arith.constant 0 : i32
    return %arg1, %c0_i32, %c0_i32_0 : i32, i32, i32
  }
  func.func @transform_9(%arg0: i32, %arg1: i32) -> (i32, i32, i32) {
    %c0_i32 = arith.constant 0 : i32
    %c0_i32_0 = arith.constant 0 : i32
    %c0_i32_1 = arith.constant 0 : i32
    return %arg1, %c0_i32, %c0_i32_0 : i32, i32, i32
  }
  func.func @transform_10(%arg0: i32, %arg1: i32) -> (i32, i32, i32) {
    %c0_i32 = arith.constant 0 : i32
    %c0_i32_0 = arith.constant 0 : i32
    %c0_i32_1 = arith.constant 0 : i32
    return %arg1, %c0_i32, %c0_i32_0 : i32, i32, i32
  }
  func.func @transform_11(%arg0: i32, %arg1: i32) -> (i32, i32, i32) {
    %c0_i32 = arith.constant 0 : i32
    %c0_i32_0 = arith.constant 0 : i32
    %c0_i32_1 = arith.constant 0 : i32
    return %arg1, %c0_i32, %c0_i32_0 : i32, i32, i32
  }
  func.func @transform_12(%arg0: i32, %arg1: i32) -> (i32, i32, i32) {
    %c0_i32 = arith.constant 0 : i32
    %c0_i32_0 = arith.constant 0 : i32
    %c0_i32_1 = arith.constant 0 : i32
    return %arg1, %c0_i32, %c0_i32_0 : i32, i32, i32
  }
  func.func @transform_13(%arg0: i32, %arg1: i32) -> (i32, i32) {
    %c0_i32 = arith.constant 0 : i32
    %c0_i32_0 = arith.constant 0 : i32
    %c0_i32_1 = arith.constant 0 : i32
    return %c0_i32, %c0_i32_0 : i32, i32
  }
  func.func @transform_14(%arg0: i32, %arg1: i32) -> (i32, i32) {
    %c0_i32 = arith.constant 0 : i32
    %c0_i32_0 = arith.constant 0 : i32
    %c0_i32_1 = arith.constant 0 : i32
    return %c0_i32, %c0_i32_0 : i32, i32
  }
  func.func @transform_15(%arg0: i32, %arg1: i32) -> (i32, i32, i32) {
    %c0_i32 = arith.constant 0 : i32
    %c0_i32_0 = arith.constant 0 : i32
    %c0_i32_1 = arith.constant 0 : i32
    return %arg0, %c0_i32, %c0_i32_0 : i32, i32, i32
  }
}

</mosaic_0001>

<bundles_post_ra>
// kernel: transformer_forward.1
= control target key start
LH: loop header
LB: loop body
LE: loop exit
PB: predicated region body
PF: predicated region fallthrough
CT: control target
= control target key end

     0   :  { %s2940_s0 = inlined_call_operand.vmem [shape: f32[2,8,32], index: 0, kind: input, shape index: {}]   ;;  %s2941_s1 = inlined_call_operand.vmem [shape: bf16[2,96,32], index: 1, kind: input, shape index: {}]   ;;  %s2942_s2 = inlined_call_operand.vmem [shape: f32[2,1,96], index: 2, kind: input, shape index: {}]   ;;  %s2943_s3 = inlined_call_operand.vmem [shape: bf16[2,32,32], index: 3, kind: input, shape index: {}]   ;;  %s2944_s4 = inlined_call_operand.vmem [shape: f32[2,1,32], index: 4, kind: input, shape index: {}]   ;;  %s2945_s5 = inlined_call_operand.vmem [shape: f32[2,1,32], index: 5, kind: input, shape index: {}]   ;;  %s2946_s6 = inlined_call_operand.vmem [shape: f32[2,1,32], index: 6, kind: input, shape index: {}]   ;;  %s2947_s7 = inlined_call_operand.vmem [shape: bf16[2,64,32], index: 7, kind: input, shape index: {}]   ;;  %s2948_s8 = inlined_call_operand.vmem [shape: f32[2,1,64], index: 8, kind: input, shape index: {}]   ;;  %s2949_s9 = inlined_call_operand.vmem [shape: bf16[2,32,64], index: 9, kind: input, shape index: {}]   ;;  %s2950_s10 = inlined_call_operand.vmem [shape: f32[2,1,32], index: 10, kind: input, shape index: {}]   ;;  %s2951_s11 = inlined_call_operand.vmem [shape: f32[2,1,32], index: 11, kind: input, shape index: {}]   ;;  %s2952_s12 = inlined_call_operand.vmem [shape: f32[2,1,32], index: 12, kind: input, shape index: {}]   ;;  %s2953_s13 = inlined_call_operand.vmem [shape: bf16[128,32], index: 13, kind: input, shape index: {}]   ;;  %s2954_s14 = inlined_call_operand.vmem [shape: f32[1,128], index: 14, kind: input, shape index: {}]   ;;  %s2955_s15 = inlined_call_operand.hbm [shape: f32[2,1,128], index: 15, kind: output, shape index: {}]  }
   0x1   :  { %2970 = sst [smem:[#allocation21_spill]] %s2940_s0 }
   0x2   :  { %2971 = sst [smem:[#allocation22_spill]] %s2941_s1 }
   0x3   :  { %2972 = sst [smem:[#allocation23_spill]] %s2942_s2 }
   0x4   :  { %2973 = sst [smem:[#allocation24_spill]] %s2943_s3 }
   0x5   :  { %2974 = sst [smem:[#allocation25_spill]] %s2947_s7 }
   0x6   :  { %2975 = sst [smem:[#allocation26_spill]] %s2953_s13 }
   0x7   :  { %2976 = sst [smem:[#allocation27_spill]] %s2954_s14 }
   0x8   :  { %2977 = sst [smem:[#allocation28_spill]] %s2955_s15 }
   0x9   :  { %20 = vsyncpa [#allocation7], 0 }
   0xa   :  { %22 = vsyncpa [#allocation7 + $0x1], 0  ;;  %s2543_s18 = smov 0   ;;  %s2545_s19 = smov 0  }
   0xb   :  { %s2547_s20 = smov 0   ;;  %s2549_s21 = smov 0  }
   0xc   :  { %s2551_s22 = smov 0   ;;  %s2553_s23 = smov 0  }
   0xd   :  { %s2555_s24 = smov 0   ;;  %s2557_s25 = smov 0  }
   0xe LB: > { %2978 = sst [smem:[#allocation9_spill]] %s2414_s18  ;;  %s1991_s26 = sadd.s32 4294967295, %s2442_s25   ;;  %s2442_s25 = sphi %s2557_s25, %s28_s25   ;;  %s2438_s24 = sphi %s2555_s24, %s3019_s24   ;;  %s2434_s23 = sphi %s2553_s23, %s3018_s23   ;;  %s2430_s22 = sphi %s2551_s22, %s3017_s22   ;;  %s2426_s21 = sphi %s2549_s21, %s3016_s21   ;;  %s2422_s20 = sphi %s2547_s20, %s3015_s20   ;;  %s2418_s19 = sphi %s2545_s19, %s3021_s19   ;;  %s2414_s18 = sphi %s2543_s18, %s3020_s18  }
   0xf   : > { %2979 = sst [smem:[#allocation10_spill]] %s2422_s20  ;;  %s1992_s27 = sadd.s32 4294967294, %s2442_s25  }
  0x10   : > { %2980 = sst [smem:[#allocation11_spill]] %s2426_s21  ;;  %s37_s28 = sadd.s32 1, %s2434_s23 }
  0x11   : > { %2981 = sst [smem:[#allocation12_spill]] %s2430_s22  ;;  %p38_p0 = scmp.ge.s32.totalorder %s37_s28, 2 }
  0x12   : > { %2982 = sst [smem:[#allocation13_spill]] %s2434_s23  ;;  %s40_s29 = sadd.s32 1, %s2438_s24 }
  0x13   : > { %2983 = sst [smem:[#allocation14_spill]] %s2438_s24  ;;  %p437_p1 = scmp.ne.s32.totalorder %s2422_s20, %s2418_s19 }
  0x14   : > { %2984 = sst [smem:[#allocation15_spill]] %s2442_s25  ;;  %p438_p2 = scmp.eq.s32.totalorder %s1991_s26, 3 }
  0x15   : > { %s3023_s28 = smov (%p38_p0, %s37_s28), 0  ;;  %s3025_s29 = smov (!%p38_p0, %s40_s29), %s2438_s24 }
  0x16   : > { %2985 = sst [smem:[#allocation16_spill]] %s3023_s28  ;;  %p2592_p3 = por %p438_p2, %p437_p1 }
  0x17   : > { %p443_p4 = scmp.ne.s32.totalorder %s2418_s19, %s2414_s18  ;;  %p42_p5 = scmp.ge.s32.totalorder %s3025_s29, 2 }
  0x18   : > { %s2986_s30 = scalar_select %p2592_p3, 1, 0 }
  0x19   : > { %p444_p6 = scmp.eq.s32.totalorder %s1992_s27, 3  ;;  %p1995_p7 = scmp.ge.s32.totalorder %s2442_s25, 1 }
  0x1a   : > { %2987 = sst [smem:[#allocation17_spill]] %s2986_s30  ;;  %p555_p8 = scmp.lt.s32.totalorder %s2442_s25, 5 }
  0x1b   : > { %s3027_s29 = smov (%p42_p5, %s3025_s29), 0  ;;  %p2602_p9 = por %p444_p6, %p443_p4 }
  0x1c   : > { %2988 = sst [smem:[#allocation18_spill]] %s3027_s29  ;;  %p556_p10 = pnand %p1995_p7, %p555_p8 }
  0x1d   : > { %s2989_s16 = scalar_select %p2602_p9, 1, 0 }
  0x1e   : > { %s424_s17 = ssub.s32 %s2438_s24, %s3027_s29  ;;  %s427_s26 = sadd.s32 1, %s2422_s20 }
  0x1f   : > { %2990 = sst [smem:[#allocation19_spill]] %s2989_s16  ;;  %p425_p11 = scmp.eq.s32.totalorder %s424_s17, 0 }
  0x20   : > { %559 = sbr.rel (%p556_p10) target bundleno = 2890 (0xb4a), region = 80  ;;  %p645_p12 = scmp.lt.s32.totalorder (!%p556_p10), %s2430_s22, 1 }
  0x21   : > { %s2610_s28 = scalar_select %p425_p11, %s2422_s20, %s427_s26  }
  0x22   : > { %p649_p13 = scmp.lt.s32.totalorder (!%p556_p10), %s2426_s21, 1  ;;  %s2992_s0 = sld [smem:[#allocation21_spill]] (!%p556_p10) }
  0x23   : > { %2991 = sst [smem:[#allocation20_spill]] %s2610_s28  ;;  %s2994_s1 = sld [smem:[#allocation22_spill]] (!%p556_p10) }
  0x24   : > { %s2995_s3 = sld [smem:[#allocation24_spill]] (!%p556_p10)  ;;  %s2996_s7 = sld [smem:[#allocation25_spill]] (!%p556_p10) }
  0x25   : > { %s2998_s14 = sld [smem:[#allocation11_spill]] (!%p556_p10) }
  0x27   : > { %s646_s23 = scalar_select %p645_p12, %s2430_s22, 1 }
  0x28   : > { %s2617_s18 = scalar_select %p649_p13, %s2426_s21, 1 }
  0x29   : > { %s1996_s17 = sshll.u32 %s646_s23, 3 }
  0x2a   : > { %s648_s27 = scalar_lea.vmem %s2992_s0, %s1996_s17  ;;  %s2216_s24 = smul.u32 48, %s2617_s18 }
  0x2b   : > { %s2055_s25 = sshll.u32 %s2617_s18, 4  ;;  %s2056_s15 = sshll.u32 %s2617_s18, 5 }
  0x2c   : > { %s2631_s22 = scalar_lea.vmem %s2994_s1, %s2216_s24  ;;  %s2636_s23 = scalar_lea.vmem %s2995_s3, %s2055_s25 }
  0x2d   : > { %s2654_s1 = scalar_lea.vmem %s2996_s7, %s2056_s15  ;;  %s678_s3 = scalar_lea.vmem %s2948_s8, %s2617_s18 }
  0x2e   : > { %s2663_s17 = scalar_lea.vmem %s2949_s9, %s2055_s25  ;;  %s686_s16 = scalar_lea.vmem %s2950_s10, %s2617_s18 }
  0x2f   : > { %s689_s20 = scalar_lea.vmem %s2951_s11, %s2617_s18  ;;  %s692_s30 = scalar_lea.vmem %s2952_s12, %s2617_s18 }
  0x30   : > { %s2997_s7 = sand.u32 1, %s2418_s19   ;;  %p2004_p0 = scmp.ne.s32.totalorder %s2998_s14, 0 }
  0x31   : > { %s2679_s13 = scalar_lea.vmem [#allocation6], %s2997_s7  ;;  %v698_v0 = vld [vmem:[%s648_s27] sm:$0xff] (!%p2004_p0)  ;;  %vm699_vm0 = vcmask (!%p2004_p0), 261120  }
  0x32   : > { %697 = sbr.rel (%p2004_p0) target bundleno = 57 (0x39), region = 84  ;;  %700 = vst.msk [vmem:[#allocation2] sm:$0xff] (!%p2004_p0), %vm699_vm0, %v698_v0 }
  0x39 PF: > { %v2306_v1 = vld [vmem:[%s2631_s22] sm:$0xff]   ;;  %v2444_v2 = vmov 0.0   ;;  %vm752_vm1 = vcmask 261120   ;;  %v2307_v4 = vld [vmem:[%s2631_s22 + $0x8] sm:$0xff]   ;;  %vm2445_vm2 = vmmov 0   ;;  %v2308_v6 = vld [vmem:[%s2631_s22 + $0x10] sm:$0xff]  }
  0x3a   : > { %2104 = vmatprep.subr.bf16.mxu0 %v2444_v2  ;;  %2120 = vmatprep.subr.bf16.mxu1 %v2444_v2  ;;  %v757_v3 = vsel %vm752_vm1, %v2306_v1, 0  ;;  %v760_v5 = vsel %vm752_vm1, %v2307_v4, 0  ;;  %v763_v7 = vsel %vm752_vm1, %v2308_v6, 0  ;;  %v2309_v8 = vld [vmem:[%s2631_s22 + $0x18] sm:$0xff]   ;;  %v2310_v10 = vld [vmem:[%s2631_s22 + $0x20] sm:$0xff]   ;;  %v2311_v12 = vld [vmem:[%s2631_s22 + $0x28] sm:$0xff]  }
  0x3b   : > { %2105 = vmatpush3.bf16.xpose.msra.mxu0 %v757_v3  ;;  %2116 = vmatprep.mubr.msk.bf16.mxu0 %vm2445_vm2, %v2444_v2  ;;  %v766_v9 = vsel %vm752_vm1, %v2309_v8, 0  ;;  %v769_v11 = vsel %vm752_vm1, %v2310_v10, 0  ;;  %v772_v13 = vsel %vm752_vm1, %v2311_v12, 0  ;;  %v2705_v14 = vld [vmem:[#allocation2] sm:$0xff]  ;;  %s2999_s25 = sld [smem:[#allocation23_spill]]  ;;  %vm815_vm3 = vcmask 781312  }
  0x3c   : > { %2106 = vmatprep.subr.bf16.mxu0 %v2444_v2  ;;  %2122 = vmatprep.mubr.msk.bf16.mxu1 %vm2445_vm2, %v2444_v2  ;;  %v702_v15 = vpack.c.bf16 %v2705_v14, %v2705_v14  ;;  %vm818_vm4 = vcmask 60416   ;;  %s2446_s22 = smov 96   ;;  %s2447_s29 = smov 120   ;;  %vm909_vm5 = vcmask 64512   ;;  %vm1145_vm6 = vcmask 1043456  }
  0x3d   : > { %s2448_s26 = smov 88   ;;  %s2449_s0 = smov 80   ;;  %vm1336_vm7 = vcmask 126016   ;;  %vm1345_vm8 = vcmask 191616   ;;  %vm1354_vm9 = vcmask 257216   ;;  %vm1572_vm10 = vcmask 523264  }
  0x3e   : > { %s2450_s21 = smov 112   ;;  %s2451_s28 = smov 72  }
  0x3f   : > { %s2452_s24 = smov 104   ;;  %s2453_s15 = smov 64  }
  0x40   : > { %s2454_s14 = smov 56   ;;  %s2455_s2 = smov 40  }
  0x41   : > { %s3000_s27 = scalar_lea.vmem %s2999_s25, %s2617_s18  ;;  %s2456_s7 = smov 48  }
  0x42   : > { %v2005_v16 = vld [vmem:[%s3000_s27] ss:$0 sm:$0xff]  ;;  %s2457_s25 = smov 8   ;;  %s2458_s27 = smov 24  }
  0x43   : > { %2107 = vmatpush3.bf16.xpose.msra.mxu0 %v760_v5 }
  0x44   : > { %2108 = vmatprep.subr.bf16.mxu0 %v2444_v2 }
  0x4b   : > { %2109 = vmatpush3.bf16.xpose.msra.mxu0 %v763_v7 }
  0x4c   : > { %2110 = vmatprep.subr.bf16.mxu0 %v2444_v2 }
  0x53   : > { %2111 = vmatpush3.bf16.xpose.msra.mxu0 %v766_v9 }
  0x54   : > { %2112 = vmatprep.subr.bf16.mxu0 %v2444_v2 }
  0x5b   : > { %2113 = vmatpush3.bf16.xpose.msra.mxu0 %v769_v11 }
  0x5c   : > { %2114 = vmatprep.subr.bf16.mxu0 %v2444_v2 }
  0x63   : > { %2115 = vmatpush3.bf16.xpose.msra.mxu0 %v772_v13 }
  0x64   : > { %2156 = vmatprep.subr.bf16.mxu0 %v2444_v2 }
  0x6a   : > { %2117 = vmatmul.mubr.msk.bf16.vlgmr.msra.gmra.mrb[0].mxu0 %vm752_vm1, %v702_v15 }
  0x6b   : > { %2158 = vmatprep.mubr.msk.bf16.mxu0 %vm2445_vm2, %v2444_v2 }
 0x13d   : > { %v808_v17 = vpop.f32.mrb[0].mxu0 }
 0x13e   : > { %v809_v18 = vadd.f32 %v2005_v16, %v808_v17  ;;  %v2118_v19 = vpop.f32.mrb[1].mxu0 }
 0x13f   : > { %v811_v20 = vpop.f32.mrb[2].mxu0 }
 0x140   : > { %v814_v21 = vpack.c.bf16 %v809_v18, %v809_v18  ;;  %v2119_v22 = vpop.f32.mrb[3].mxu0 }
 0x142   : > { %816 = vst.msk [vmem:[#allocation3] sm:$0xf] %vm815_vm3, %v814_v21 }
 0x149   : > { %v817_v23 = vld [vmem:[#allocation3] sm:$0xf] }
 0x14a   : > { %v841_v24 = vld [vmem:[#allocation3] sm:$0xf]  ;;  %819 = vst.msk [vmem:[#allocation4] sm:$0xf] %vm818_vm4, %v817_v23 }
 0x14b   : > { %v820_v25 = vld [vmem:[#allocation3] sm:$0xf]  ;;  %843 = vrot.lane.b32.xlu0 %v841_v24, %s2446_s22  ;;  %s2459_s22 = smov 16  }
 0x14c   : > { %822 = vrot.lane.b32.xlu1 %v820_v25, %s2447_s29  ;;  %v848_v26 = vld [vmem:[#allocation3] sm:$0xf] }
 0x14d   : > { %v855_v27 = vld [vmem:[#allocation3] sm:$0xf] }
 0x14e   : > { %v827_v28 = vld [vmem:[#allocation3] sm:$0xf] }
 0x14f   : > { %850 = vrot.lane.b32.xlu0 %v848_v26, %s2448_s26  ;;  %v862_v29 = vld [vmem:[#allocation3] sm:$0xf]  ;;  %s3001_s26 = scalar_lea.vmem %s2944_s4, %s2617_s18 }
 0x150   : > { %857 = vrot.lane.b32.xlu1 %v855_v27, %s2449_s0  ;;  %v834_v30 = vld [vmem:[#allocation3] sm:$0xf] }
 0x151   : > { %v897_v41 = vld [vmem:[#allocation4] sm:$0xf]  ;;  %v869_v7 = vld [vmem:[#allocation3] sm:$0xf] }
 0x152   : > { %v876_v8 = vld [vmem:[#allocation3] sm:$0xf] }
 0x153   : > { %829 = vrot.lane.b32.xlu0 %v827_v28, %s2450_s21 }
 0x154   : > { %864 = vrot.lane.b32.xlu1 %v862_v29, %s2451_s28 }
 0x157   : > { %836 = vrot.lane.b32.xlu0 %v834_v30, %s2452_s24 }
 0x1bd   : > { %v844_v31 = vpop.permute.xlu0 %843 }
 0x1be   : > { %v823_v32 = vpop.permute.xlu1 %822  ;;  %847 = vst.msk [vmem:[#allocation4 + $0x10] sm:$0xf] %vm818_vm4, %v844_v31 }
 0x1bf   : > { %826 = vst.msk [vmem:[#allocation4 + $0x4] sm:$0xf] %vm818_vm4, %v823_v32 }
 0x1c1   : > { %v851_v33 = vpop.permute.xlu0 %850 }
 0x1c2   : > { %v858_v34 = vpop.permute.xlu1 %857  ;;  %854 = vst.msk [vmem:[#allocation4 + $0x14] sm:$0xf] %vm818_vm4, %v851_v33 }
 0x1c3   : > { %861 = vst.msk [vmem:[#allocation4 + $0x18] sm:$0xf] %vm818_vm4, %v858_v34  ;;  %v890_v34 = vld [vmem:[#allocation3] sm:$0xf] }
 0x1c5   : > { %v830_v35 = vpop.permute.xlu0 %829  ;;  %v901_v37 = vld [vmem:[#allocation4 + $0x10] sm:$0xf] }
 0x1c6   : > { %v865_v36 = vpop.permute.xlu1 %864  ;;  %833 = vst.msk [vmem:[#allocation4 + $0x8] sm:$0xf] %vm818_vm4, %v830_v35  ;;  %v914_v38 = vsel %vm909_vm5, %v901_v37, 0  ;;  %v898_v44 = vld [vmem:[#allocation4 + $0x4] sm:$0xf] }
 0x1c7   : > { %868 = vst.msk [vmem:[#allocation4 + $0x1c] sm:$0xf] %vm818_vm4, %v865_v36  ;;  %2121 = vmatpush3.bf16.xpose.msra.mxu1 %v914_v38  ;;  %v883_v35 = vld [vmem:[#allocation3] sm:$0xf] }
 0x1c8   : > { %2126 = vmatprep.subr.bf16.mxu1 %v2444_v2 }
 0x1c9   : > { %v837_v39 = vpop.permute.xlu0 %836  ;;  %v902_v40 = vld [vmem:[#allocation4 + $0x14] sm:$0xf] }
 0x1ca   : > { %840 = vst.msk [vmem:[#allocation4 + $0xc] sm:$0xf] %vm818_vm4, %v837_v39  ;;  %v960_v42 = vsel %vm909_vm5, %v902_v40, 0  ;;  %v903_v43 = vld [vmem:[#allocation4 + $0x18] sm:$0xf] }
 0x1cb   : > { %v1006_v45 = vsel %vm909_vm5, %v903_v43, 0 }
 0x1cd   : > { %v899_v47 = vld [vmem:[#allocation4 + $0x8] sm:$0xf] }
 0x1ce   : > { %2123 = vmatmul.mubr.msk.bf16.vlgmr.msra.gmra.mrb[0].mxu1 %vm909_vm5, %v897_v41  ;;  %v904_v46 = vld [vmem:[#allocation4 + $0x1c] sm:$0xf] }
 0x1cf   : > { %2127 = vmatpush3.bf16.xpose.msra.mxu1 %v960_v42  ;;  %2128 = vmatprep.mubr.msk.bf16.mxu1 %vm2445_vm2, %v2444_v2  ;;  %v1052_v48 = vsel %vm909_vm5, %v904_v46, 0 }
 0x1d0   : > { %2132 = vmatprep.subr.bf16.mxu1 %v2444_v2 }
 0x1d1   : > { %v900_v49 = vld [vmem:[#allocation4 + $0xc] sm:$0xf] }
 0x1d6   : > { %2129 = vmatmul.mubr.msk.bf16.vlgmr.msra.gmra.mrb[4].mxu1 %vm909_vm5, %v898_v44 }
 0x1d7   : > { %2133 = vmatpush3.bf16.xpose.msra.mxu1 %v1006_v45  ;;  %2134 = vmatprep.mubr.msk.bf16.mxu1 %vm2445_vm2, %v2444_v2 }
 0x1d8   : > { %2138 = vmatprep.subr.bf16.mxu1 %v2444_v2 }
 0x1de   : > { %2135 = vmatmul.mubr.msk.bf16.vlgmr.msra.gmra.mrb[8].mxu1 %vm909_vm5, %v899_v47 }
 0x1df   : > { %2139 = vmatpush3.bf16.xpose.msra.mxu1 %v1052_v48  ;;  %2140 = vmatprep.mubr.msk.bf16.mxu1 %vm2445_vm2, %v2444_v2 }
 0x1e0   : > { %2144 = vmatprep.subr.bf16.mxu1 %v2444_v2 }
 0x1e6   : > { %2141 = vmatmul.mubr.msk.bf16.vlgmr.msra.gmra.mrb[12].mxu1 %vm909_vm5, %v900_v49 }
 0x1e7   : > { %2146 = vmatprep.mubr.msk.bf16.mxu1 %vm2445_vm2, %v2444_v2 }
 0x2a1   : > { %v950_v50 = vpop.f32.mrb[0].mxu1 }
 0x2a2   : > { %v2124_v51 = vpop.f32.mrb[1].mxu1  ;;  %v1094_v52 = vsel %vm909_vm5, %v950_v50, -inf }
 0x2a3   : > { %1095 = vmax.xlane.f32.xlu1 %v1094_v52  ;;  %v953_v53 = vpop.f32.mrb[2].mxu1 }
 0x2a4   : > { %v2125_v54 = vpop.f32.mrb[3].mxu1 }
 0x2a9   : > { %v996_v55 = vpop.f32.mrb[4].mxu1 }
 0x2aa   : > { %v2130_v56 = vpop.f32.mrb[5].mxu1  ;;  %v1097_v57 = vsel %vm909_vm5, %v996_v55, -inf }
 0x2ab   : > { %1098 = vmax.xlane.f32.xlu0 %v1097_v57  ;;  %v999_v58 = vpop.f32.mrb[6].mxu1 }
 0x2ac   : > { %v2131_v59 = vpop.f32.mrb[7].mxu1 }
 0x2b1   : > { %v1042_v60 = vpop.f32.mrb[8].mxu1 }
 0x2b2   : > { %v2136_v61 = vpop.f32.mrb[9].mxu1  ;;  %v1100_v62 = vsel %vm909_vm5, %v1042_v60, -inf }
 0x2b3   : > { %1101 = vmax.xlane.f32.xlu0 %v1100_v62  ;;  %v1045_v63 = vpop.f32.mrb[10].mxu1 }
 0x2b4   : > { %v2137_v0 = vpop.f32.mrb[11].mxu1 }
 0x2b9   : > { %v1088_v1 = vpop.f32.mrb[12].mxu1 }
 0x2ba   : > { %v2142_v3 = vpop.f32.mrb[13].mxu1  ;;  %v1103_v4 = vsel %vm909_vm5, %v1088_v1, -inf }
 0x2bb   : > { %1104 = vmax.xlane.f32.xlu1 %v1103_v4  ;;  %v1091_v5 = vpop.f32.mrb[14].mxu1 }
 0x2bc   : > { %v2143_v6 = vpop.f32.mrb[15].mxu1 }
 0x2c9   : > { %871 = vrot.lane.b32.xlu0 %v869_v7, %s2453_s15  ;;  %s3003_s15 = scalar_lea.vmem %s2946_s6, %s2617_s18 }
 0x2cc   : > { %878 = vrot.lane.b32.xlu1 %v876_v8, %s2454_s14 }
 0x330   : > { %v1096_v9 = vpop.xlane.xlu1 %1095 }
 0x331   : > { %v1106_v10 = vsub.f32 %v950_v50, %v1096_v9  ;;  %v2313_v9 = vld [vmem:[%s2636_s23 + $0x8] sm:$0xff]  }
 0x333   : > { %v1110_v11 = vmul.f32 1.442695, %v1106_v10  ;;  %v1385_v10 = vsel %vm752_vm1, %v2313_v9, 0 }
 0x335   : > { %2320 = vpow2.f32 %v1110_v11 }
 0x338   : > { %v1099_v12 = vpop.xlane.xlu0 %1098 }
 0x339   : > { %v1107_v13 = vsub.f32 %v996_v55, %v1099_v12 }
 0x33b   : > { %v1112_v15 = vmul.f32 1.442695, %v1107_v13 }
 0x33d   : > { %2322 = vpow2.f32 %v1112_v15 }
 0x33f   : > { %v2321_v16 = vpop.eup %2320 }
 0x340   : > { %v1102_v17 = vpop.xlane.xlu0 %1101  ;;  %v1118_v18 = vsel %vm909_vm5, %v2321_v16, 0.0 }
 0x341   : > { %v1108_v19 = vsub.f32 %v1042_v60, %v1102_v17  ;;  %1119 = vadd.xlane.f32.xlu0 %v1118_v18  ;;  %v2312_v60 = vld [vmem:[%s2636_s23] sm:$0xff]  }
 0x342   : > { %v1382_v62 = vsel %vm752_vm1, %v2312_v60, 0 }
 0x343   : > { %v1114_v20 = vmul.f32 1.442695, %v1108_v19 }
 0x344   : > { %v872_v21 = vpop.permute.xlu0 %871 }
 0x345   : > { %2324 = vpow2.f32 %v1114_v20  ;;  %875 = vst.msk [vmem:[#allocation4 + $0x20] sm:$0xf] %vm818_vm4, %v872_v21 }
 0x347   : > { %v2323_v22 = vpop.eup %2322 }
 0x348   : > { %v1105_v23 = vpop.xlane.xlu1 %1104  ;;  %v1121_v24 = vsel %vm909_vm5, %v2323_v22, 0.0 }
 0x349   : > { %v1109_v25 = vsub.f32 %v1088_v1, %v1105_v23  ;;  %1122 = vadd.xlane.f32.xlu1 %v1121_v24 }
 0x34b   : > { %v1116_v26 = vmul.f32 1.442695, %v1109_v25 }
 0x34c   : > { %v879_v27 = vpop.permute.xlu1 %878  ;;  %v905_v28 = vld [vmem:[#allocation4 + $0x20] sm:$0xf] }
 0x34d   : > { %2326 = vpow2.f32 %v1116_v26  ;;  %882 = vst.msk [vmem:[#allocation4 + $0x24] sm:$0xf] %vm818_vm4, %v879_v27  ;;  %v1147_v29 = vsel %vm1145_vm6, %v905_v28, 0  ;;  %v2024_v26 = vld [vmem:[%s3001_s26] ss:$0 sm:$0xff] }
 0x34e   : > { %2145 = vmatpush3.bf16.msra.mxu1 %v1147_v29 }
 0x34f   : > { %v2325_v30 = vpop.eup %2324  ;;  %2150 = vmatprep.subr.bf16.mxu1 %v2444_v2 }
 0x350   : > { %v1124_v31 = vsel %vm909_vm5, %v2325_v30, 0.0 }
 0x351   : > { %1125 = vadd.xlane.f32.xlu0 %v1124_v31 }
 0x354   : > { %v906_v40 = vld [vmem:[#allocation4 + $0x24] sm:$0xf] }
 0x355   : > { %v1193_v43 = vsel %vm1145_vm6, %v906_v40, 0 }
 0x357   : > { %v2327_v32 = vpop.eup %2326 }
 0x358   : > { %v1127_v33 = vsel %vm909_vm5, %v2327_v32, 0.0 }
 0x359   : > { %1128 = vadd.xlane.f32.xlu1 %v1127_v33 }
 0x367   : > { %892 = vrot.lane.b32.xlu0 %v890_v34, %s2455_s2  ;;  %v2314_v34 = vld [vmem:[%s2654_s1] sm:$0xff]  }
 0x36a   : > { %885 = vrot.lane.b32.xlu1 %v883_v35, %s2456_s7  ;;  %v1498_v35 = vsel %vm752_vm1, %v2314_v34, 0 }
 0x3ce   : > { %v1120_v36 = vpop.xlane.xlu0 %1119 }
 0x3cf   : > { %2328 = vrcp.f32 %v1120_v36 }
 0x3d6   : > { %v1123_v37 = vpop.xlane.xlu1 %1122 }
 0x3d7   : > { %2330 = vrcp.f32 %v1123_v37 }
 0x3d9   : > { %v2329_v38 = vpop.eup %2328 }
 0x3da   : > { %v1134_v39 = vmul.f32 %v2329_v38, %v2321_v16 }
 0x3dc   : > { %v1138_v41 = vpack.c.bf16 %v1134_v39, %v1134_v39 }
 0x3de   : > { %2147 = vmatmul.mubr.msk.bf16.vlgmr.msra.gmra.mrb[16].mxu1 %vm909_vm5, %v1138_v41  ;;  %v1126_v42 = vpop.xlane.xlu0 %1125 }
 0x3df   : > { %2151 = vmatpush3.bf16.msra.mxu1 %v1193_v43  ;;  %2152 = vmatprep.mubr.msk.bf16.mxu1 %vm2445_vm2, %v2444_v2  ;;  %2332 = vrcp.f32 %v1126_v42  ;;  %v2316_v42 = vld [vmem:[%s2654_s1 + $0x10] sm:$0xff]  }
 0x3e0   : > { %2162 = vmatprep.subr.bf16.mxu1 %v2444_v2  ;;  %v1504_v43 = vsel %vm752_vm1, %v2316_v42, 0 }
 0x3e1   : > { %v2331_v44 = vpop.eup %2330 }
 0x3e2   : > { %v1135_v45 = vmul.f32 %v2331_v44, %v2323_v22  ;;  %v893_v46 = vpop.permute.xlu0 %892  ;;  %v2317_v44 = vld [vmem:[%s2654_s1 + $0x18] sm:$0xff]  }
 0x3e3   : > { %896 = vst.msk [vmem:[#allocation4 + $0x2c] sm:$0xf] %vm818_vm4, %v893_v46  ;;  %v2318_v46 = vld [vmem:[%s2663_s17] sm:$0xff]  }
 0x3e4   : > { %v1139_v47 = vpack.c.bf16 %v1135_v45, %v1135_v45  ;;  %v1507_v45 = vsel %vm752_vm1, %v2317_v44, 0 }
 0x3e6   : > { %2153 = vmatmul.mubr.msk.bf16.vlgmr.msra.gmra.mrb[20].mxu1 %vm909_vm5, %v1139_v47  ;;  %v1129_v48 = vpop.xlane.xlu1 %1128  ;;  %v1577_v47 = vsel %vm1572_vm10, %v2318_v46, 0 }
 0x3e7   : > { %2334 = vrcp.f32 %v1129_v48  ;;  %2164 = vmatprep.mubr.msk.bf16.mxu1 %vm2445_vm2, %v2444_v2 }
 0x3e9   : > { %v2333_v52 = vpop.eup %2332 }
 0x3ea   : > { %v886_v49 = vpop.permute.xlu1 %885  ;;  %v908_v50 = vld [vmem:[#allocation4 + $0x2c] sm:$0xf]  ;;  %v1136_v54 = vmul.f32 %v2333_v52, %v2325_v30 }
 0x3eb   : > { %889 = vst.msk [vmem:[#allocation4 + $0x28] sm:$0xf] %vm818_vm4, %v886_v49  ;;  %v1285_v51 = vsel %vm1145_vm6, %v908_v50, 0 }
 0x3ec   : > { %2163 = vmatpush3.bf16.msra.mxu1 %v1285_v51  ;;  %v1140_v59 = vpack.c.bf16 %v1136_v54, %v1136_v54  ;;  %v2029_v54 = vld [vmem:[%s3003_s15] ss:$0 sm:$0xff] }
 0x3ed   : > { %2176 = vmatprep.subr.bf16.mxu1 %v2444_v2 }
 0x3f1   : > { %v2335_v53 = vpop.eup %2334 }
 0x3f2   : > { %v1137_v55 = vmul.f32 %v2335_v53, %v2327_v32  ;;  %v907_v56 = vld [vmem:[#allocation4 + $0x28] sm:$0xf] }
 0x3f3   : > { %v1239_v57 = vsel %vm1145_vm6, %v907_v56, 0 }
 0x3f4   : > { %2157 = vmatpush3.bf16.msra.mxu0 %v1239_v57  ;;  %v1141_v58 = vpack.c.bf16 %v1137_v55, %v1137_v55  ;;  %v2319_v57 = vld [vmem:[%s2663_s17 + $0x8] sm:$0xff]  }
 0x3f5   : > { %2168 = vmatprep.subr.bf16.mxu0 %v2444_v2 }
 0x3f6   : > { %2165 = vmatmul.mubr.msk.bf16.vlgmr.msra.gmra.mrb[24].mxu1 %vm909_vm5, %v1141_v58  ;;  %v1580_v58 = vsel %vm1572_vm10, %v2319_v57, 0 }
 0x3f7   : > { %2159 = vmatmul.mubr.msk.bf16.vlgmr.msra.gmra.mrb[4].mxu0 %vm909_vm5, %v1140_v59  ;;  %2184 = vmatprep.mubr.msk.bf16.mxu1 %vm2445_vm2, %v2444_v2  ;;  %v2030_v59 = vld [vmem:[%s678_s3] ss:$0 sm:$0xff] }
 0x3f8   : > { %2172 = vmatprep.mubr.msk.bf16.mxu0 %vm2445_vm2, %v2444_v2  ;;  %2177 = vmatpush3.bf16.xpose.msra.mxu1 %v1498_v35 }
 0x3f9   : > { %2178 = vmatprep.subr.bf16.mxu1 %v2444_v2 }
 0x3fd   : > { %2169 = vmatpush3.bf16.xpose.msra.mxu0 %v1382_v62 }
 0x3fe   : > { %2170 = vmatprep.subr.bf16.mxu0 %v2444_v2 }
 0x405   : > { %2171 = vmatpush3.bf16.xpose.msra.mxu0 %v1385_v10 }
 0x406   : > { %2188 = vmatprep.subr.bf16.mxu0 %v2444_v2 }
 0x4b1   : > { %v1183_v61 = vpop.f32.mrb[16].mxu1 }
 0x4b2   : > { %v1327_v63 = vpack.c.bf16 %v1183_v61, %v1183_v61  ;;  %v2148_v0 = vpop.f32.mrb[17].mxu1 }
 0x4b3   : > { %v1186_v1 = vpop.f32.mrb[18].mxu1 }
 0x4b4   : > { %1328 = vst.msk [vmem:[#allocation5] sm:$0xf] %vm818_vm4, %v1327_v63  ;;  %v2149_v3 = vpop.f32.mrb[19].mxu1 }
 0x4b9   : > { %v1229_v4 = vpop.f32.mrb[20].mxu1 }
 0x4ba   : > { %v2058_v5 = vpack.c.bf16 %v1229_v4, %v1229_v4  ;;  %v2154_v6 = vpop.f32.mrb[21].mxu1  ;;  %v2036_v4 = vld [vmem:[%s686_s16] ss:$0 sm:$0xff] }
 0x4bb   : > { %v1232_v7 = vpop.f32.mrb[22].mxu1 }
 0x4bc   : > { %1333 = vrot.lane.b32.xlu1 %v2058_v5, %s2457_s25  ;;  %v2155_v8 = vpop.f32.mrb[23].mxu1 }
 0x4c9   : > { %v1321_v11 = vpop.f32.mrb[24].mxu1 }
 0x4ca   : > { %v2060_v12 = vpack.c.bf16 %v1321_v11, %v1321_v11  ;;  %v1275_v13 = vpop.f32.mrb[4].mxu0  ;;  %v2166_v15 = vpop.f32.mrb[25].mxu1 }
 0x4cb   : > { %v2059_v16 = vpack.c.bf16 %v1275_v13, %v1275_v13  ;;  %v2160_v17 = vpop.f32.mrb[5].mxu0  ;;  %v1324_v18 = vpop.f32.mrb[26].mxu1 }
 0x4cc   : > { %1351 = vrot.lane.b32.xlu1 %v2060_v12, %s2458_s27  ;;  %v1278_v19 = vpop.f32.mrb[6].mxu0  ;;  %v2167_v20 = vpop.f32.mrb[27].mxu1 }
 0x4cd   : > { %1342 = vrot.lane.b32.xlu0 %v2059_v16, %s2459_s22  ;;  %v2161_v21 = vpop.f32.mrb[7].mxu0  ;;  %s3004_s22 = sld [smem:[#allocation11_spill]] }
 0x4d3   : > { %p2042_p1 = scmp.ne.s32.totalorder %s3004_s22, 1 }
 0x4d4   : > { %s3005_s26 = sld [smem:[#allocation26_spill]] (!%p2042_p1)  ;;  %vm2461_vm11 = vmmov (!%p2042_p1), 0   ;;  %s3006_s27 = sld [smem:[#allocation27_spill]] (!%p2042_p1) }
 0x4da   : > { %v2343_v34 = vld [vmem:[%s3005_s26 + $0x18] sm:$0xff] (!%p2042_p1)  }
 0x4db   : > { %v1737_v35 = vsel (!%p2042_p1), %vm752_vm1, %v2343_v34, 0 }
 0x52e   : > { %v1334_v22 = vpop.permute.xlu1 %1333 }
 0x52f   : > { %1337 = vst.msk [vmem:[#allocation5] sm:$0xf] %vm1336_vm7, %v1334_v22  ;;  %v2040_v22 = vld [vmem:[%s689_s20] ss:$0 sm:$0xff] }
 0x53e   : > { %v1352_v24 = vpop.permute.xlu1 %1351 }
 0x53f   : > { %v1343_v23 = vpop.permute.xlu0 %1342 }
 0x540   : > { %1346 = vst.msk [vmem:[#allocation5] sm:$0xf] %vm1345_vm8, %v1343_v23 }
 0x541   : > { %1355 = vst.msk [vmem:[#allocation5] sm:$0xf] %vm1354_vm9, %v1352_v24  ;;  %v2041_v24 = vld [vmem:[%s692_s30] ss:$0 sm:$0xff] }
 0x548   : > { %v1356_v25 = vld [vmem:[#allocation5] sm:$0xf] }
 0x549   : > { %2173 = vmatmul.mubr.msk.bf16.vlgmr.msra.gmra.mrb[8].mxu0 %vm752_vm1, %v1356_v25 }
 0x54a   : > { %2192 = vmatprep.mubr.msk.bf16.mxu0 %vm2445_vm2, %v2444_v2  ;;  %2189 = vmatpush3.bf16.xpose.msra.mxu0 %v1577_v47  ;;  %v2347_v47 = vld [vmem:[%s3005_s26 + $0x38] sm:$0xff] (!%p2042_p1)  }
 0x54b   : > { %2190 = vmatprep.subr.bf16.mxu0 %v2444_v2 }
 0x552   : > { %2191 = vmatpush3.bf16.xpose.msra.mxu0 %v1580_v58 }
 0x61c   : > { %v1421_v27 = vpop.f32.mrb[8].mxu0 }
 0x61d   : > { %v1422_v28 = vadd.f32 %v2024_v26, %v1421_v27  ;;  %v2174_v29 = vpop.f32.mrb[9].mxu0  ;;  %v2340_v27 = vld [vmem:[%s3005_s26] sm:$0xff] (!%p2042_p1)  }
 0x61e   : > { %v1424_v30 = vpop.f32.mrb[10].mxu0  ;;  %v1728_v29 = vsel (!%p2042_p1), %vm752_vm1, %v2340_v27, 0 }
 0x61f   : > { %v2175_v31 = vpop.f32.mrb[11].mxu0  ;;  %v1427_v32 = vadd.f32 %v1422_v28, %v2705_v14  ;;  %v2315_v14 = vld [vmem:[%s2654_s1 + $0x8] sm:$0xff]   ;;  %s3002_s1 = scalar_lea.vmem %s2945_s5, %s2617_s18  ;;  %v2460_v28 = vmov (!%p2042_p1), 0.0  }
 0x620   : > { %v1501_v41 = vsel %vm752_vm1, %v2315_v14, 0  ;;  %v2028_v52 = vld [vmem:[%s3002_s1] ss:$0 sm:$0xff]  ;;  %2196 = vmatprep.subr.bf16.mxu0 (!%p2042_p1), %v2460_v28  ;;  %v2341_v30 = vld [vmem:[%s3005_s26 + $0x8] sm:$0xff] (!%p2042_p1)  }
 0x621   : > { %v1430_v33 = vsel %vm752_vm1, %v1427_v32, 0.0  ;;  %2179 = vmatpush3.bf16.xpose.msra.mxu1 %v1501_v41  ;;  %v1731_v31 = vsel (!%p2042_p1), %vm752_vm1, %v2341_v30, 0 }
 0x622   : > { %1431 = vadd.xlane.f32.xlu0 %v1430_v33  ;;  %2180 = vmatprep.subr.bf16.mxu1 %v2444_v2 }
 0x629   : > { %2181 = vmatpush3.bf16.xpose.msra.mxu1 %v1504_v43  ;;  %v2346_v43 = vld [vmem:[%s3005_s26 + $0x30] sm:$0xff] (!%p2042_p1)  }
 0x62a   : > { %2182 = vmatprep.subr.bf16.mxu1 %v2444_v2 }
 0x631   : > { %2183 = vmatpush3.bf16.xpose.msra.mxu1 %v1507_v45  ;;  %v1746_v45 = vsel (!%p2042_p1), %vm752_vm1, %v2346_v43, 0 }
 0x6af   : > { %v1432_v36 = vpop.xlane.xlu0 %1431 }
 0x6b0   : > { %v1434_v37 = vmul.f32 0.03125, %v1432_v36  ;;  %v2344_v36 = vld [vmem:[%s3005_s26 + $0x20] sm:$0xff] (!%p2042_p1)  }
 0x6b2   : > { %v1435_v38 = vsub.f32 %v1427_v32, %v1434_v37  ;;  %v2342_v32 = vld [vmem:[%s3005_s26 + $0x10] sm:$0xff] (!%p2042_p1)  }
 0x6b3   : > { %v1734_v33 = vsel (!%p2042_p1), %vm752_vm1, %v2342_v32, 0 }
 0x6b4   : > { %v1436_v39 = vmul.f32 %v1435_v38, %v1435_v38 }
 0x6b6   : > { %v1437_v40 = vsel %vm752_vm1, %v1436_v39, 0.0 }
 0x6b7   : > { %1438 = vadd.xlane.f32.xlu1 %v1437_v40  ;;  %v2345_v40 = vld [vmem:[%s3005_s26 + $0x28] sm:$0xff] (!%p2042_p1)  }
 0x6b8   : > { %v1743_v41 = vsel (!%p2042_p1), %vm752_vm1, %v2345_v40, 0 }
 0x744   : > { %v1439_v48 = vpop.xlane.xlu1 %1438 }
 0x745   : > { %v1440_v49 = vmul.f32 0.03125, %v1439_v48 }
 0x747   : > { %v1441_v50 = vadd.f32 1e-05, %v1440_v49  ;;  %v1749_v49 = vsel (!%p2042_p1), %vm752_vm1, %v2347_v47, 0 }
 0x749   : > { %2336 = vrsqrt.f32 %v1441_v50 }
 0x753   : > { %v2337_v51 = vpop.eup %2336 }
 0x754   : > { %v1443_v53 = vmul.f32 %v2337_v51, %v1435_v38  ;;  %v1740_v38 = vsel (!%p2042_p1), %vm752_vm1, %v2344_v36, 0 }
 0x756   : > { %v1450_v55 = vmul.f32 %v2028_v52, %v1443_v53  ;;  %v1683_v52 = vld [vmem:[%s3006_s27] sm:$0x1] (!%p2042_p1) }
 0x758   : > { %v1457_v2 = vadd.f32 %v2029_v54, %v1450_v55 }
 0x75a   : > { %v1458_v56 = vpack.c.bf16 %v1457_v2, %v1457_v2 }
 0x75c   : > { %2185 = vmatmul.mubr.msk.bf16.vlgmr.msra.gmra.mrb[28].mxu1 %vm752_vm1, %v1458_v56 }
 0x82f   : > { %v1543_v60 = vpop.f32.mrb[28].mxu1 }
 0x830   : > { %v1544_v61 = vadd.f32 %v2030_v59, %v1543_v60  ;;  %v2186_v62 = vpop.f32.mrb[29].mxu1 }
 0x831   : > { %v1546_v63 = vpop.f32.mrb[30].mxu1 }
 0x832   : > { %v1549_v0 = vmax.f32 %v1544_v61, 0.0  ;;  %v2187_v1 = vpop.f32.mrb[31].mxu1 }
 0x834   : > { %v1550_v3 = vpack.c.bf16 %v1549_v0, %v1549_v0 }
 0x836   : > { %2193 = vmatmul.mubr.msk.bf16.vlgmr.msra.gmra.mrb[12].mxu0 %vm1572_vm10, %v1550_v3 }
 0x837   : > { %2212 = vmatprep.mubr.msk.bf16.mxu0 (!%p2042_p1), %vm2461_vm11, %v2460_v28  ;;  %2197 = vmatpush3.bf16.xpose.msra.mxu0 (!%p2042_p1), %v1728_v29 }
 0x838   : > { %2198 = vmatprep.subr.bf16.mxu0 (!%p2042_p1), %v2460_v28 }
 0x83f   : > { %2199 = vmatpush3.bf16.xpose.msra.mxu0 (!%p2042_p1), %v1731_v31 }
 0x840   : > { %2200 = vmatprep.subr.bf16.mxu0 (!%p2042_p1), %v2460_v28 }
 0x847   : > { %2201 = vmatpush3.bf16.xpose.msra.mxu0 (!%p2042_p1), %v1734_v33 }
 0x848   : > { %2202 = vmatprep.subr.bf16.mxu0 (!%p2042_p1), %v2460_v28 }
 0x84f   : > { %2203 = vmatpush3.bf16.xpose.msra.mxu0 (!%p2042_p1), %v1737_v35 }
 0x850   : > { %2204 = vmatprep.subr.bf16.mxu0 (!%p2042_p1), %v2460_v28 }
 0x857   : > { %2205 = vmatpush3.bf16.xpose.msra.mxu0 (!%p2042_p1), %v1740_v38 }
 0x858   : > { %2206 = vmatprep.subr.bf16.mxu0 (!%p2042_p1), %v2460_v28 }
 0x85f   : > { %2207 = vmatpush3.bf16.xpose.msra.mxu0 (!%p2042_p1), %v1743_v41 }
 0x860   : > { %2208 = vmatprep.subr.bf16.mxu0 (!%p2042_p1), %v2460_v28 }
 0x867   : > { %2209 = vmatpush3.bf16.xpose.msra.mxu0 (!%p2042_p1), %v1746_v45 }
 0x868   : > { %2210 = vmatprep.subr.bf16.mxu0 (!%p2042_p1), %v2460_v28 }
 0x86f   : > { %2211 = vmatpush3.bf16.xpose.msra.mxu0 (!%p2042_p1), %v1749_v49 }
 0x909   : > { %v1616_v5 = vpop.f32.mrb[12].mxu0 }
 0x90a   : > { %v1617_v6 = vadd.f32 %v2036_v4, %v1616_v5  ;;  %v2194_v7 = vpop.f32.mrb[13].mxu0 }
 0x90b   : > { %v1619_v8 = vpop.f32.mrb[14].mxu0 }
 0x90c   : > { %v2195_v9 = vpop.f32.mrb[15].mxu0  ;;  %v1622_v10 = vadd.f32 %v1617_v6, %v1457_v2 }
 0x90e   : > { %v1625_v11 = vsel %vm752_vm1, %v1622_v10, 0.0 }
 0x90f   : > { %1626 = vadd.xlane.f32.xlu0 %v1625_v11 }
 0x99c   : > { %v1627_v12 = vpop.xlane.xlu0 %1626 }
 0x99d   : > { %v1628_v13 = vmul.f32 0.03125, %v1627_v12 }
 0x99f   : > { %v1629_v15 = vsub.f32 %v1622_v10, %v1628_v13 }
 0x9a1   : > { %v1630_v16 = vmul.f32 %v1629_v15, %v1629_v15 }
 0x9a3   : > { %v1631_v17 = vsel %vm752_vm1, %v1630_v16, 0.0 }
 0x9a4   : > { %1632 = vadd.xlane.f32.xlu0 %v1631_v17 }
 0xa31   : > { %v1633_v18 = vpop.xlane.xlu0 %1632 }
 0xa32   : > { %v1634_v19 = vmul.f32 0.03125, %v1633_v18 }
 0xa34   : > { %v1635_v20 = vadd.f32 1e-05, %v1634_v19 }
 0xa36   : > { %2338 = vrsqrt.f32 %v1635_v20 }
 0xa40   : > { %v2339_v21 = vpop.eup %2338 }
 0xa41   : > { %v1637_v23 = vmul.f32 %v2339_v21, %v1629_v15  ;;  %1656 = sbr.rel (%p2042_p1) target bundleno = 2863 (0xb2f), region = 88 }
 0xa43   : > { %v1644_v25 = vmul.f32 %v2040_v22, %v1637_v23 }
 0xa45   : > { %v1651_v26 = vadd.f32 %v2041_v24, %v1644_v25 }
 0xa47   : > { %1652 = vst.msk [vmem:[#allocation2] sm:$0xff] %vm752_vm1, %v1651_v26  ;;  %v1657_v37 = vsel (!%p2042_p1), %vm752_vm1, %v1651_v26, 0.0 }
 0xa48   : > { %v1658_v39 = vrot.slane %v1657_v37, 4 }
 0xa4a   : > { %v1659_v14 = vadd.f32 %v1658_v39, %v1657_v37 }
 0xa4c   : > { %v1660_v42 = vrot.slane %v1659_v14, 2 }
 0xa4e   : > { %v1661_v44 = vadd.f32 %v1660_v42, %v1659_v14 }
 0xa50   : > { %v1662_v46 = vrot.slane %v1661_v44, 1 }
 0xa52   : > { %v1663_v48 = vadd.f32 %v1662_v46, %v1661_v44 }
 0xa54   : > { %v1665_v50 = vmul.f32 0.125, %v1663_v48 }
 0xa56   : > { %v1666_v51 = vpack.c.bf16 %v1665_v50, %v1665_v50 }
 0xa58   : > { %2213 = vmatmul.mubr.msk.bf16.vlgmr.msra.gmra.mrb[0].mxu0 %vm752_vm1, %v1666_v51 }
 0xb2b   : > { %v1785_v53 = vpop.f32.mrb[0].mxu0 }
 0xb2c   : > { %v1786_v54 = vadd.f32 %v1785_v53, %v1683_v52  ;;  %v2214_v55 = vpop.f32.mrb[1].mxu0 }
 0xb2d   : > { %v1788_v2 = vpop.f32.mrb[2].mxu0 }
 0xb2e   : > { %1791 = vst [vmem:[%s2679_s13] sm:$0x1] %v1786_v54  ;;  %v2215_v56 = vpop.f32.mrb[3].mxu0 }
 0xb2f PF: > { %s3007_s22 = sld [smem:[#allocation12_spill]]  ;;  %s3009_s30 = sld [smem:[#allocation28_spill]] }
 0xb30   : > { %s1805_s21 = sshll.u32 %s2679_s13, 4  ;;  %s3010_s1 = sand.u32 1, %s2418_s19   ;;  %s1806_s21 = int_to_ptr.vmem [resolvable:$true] %s1805_s21 }
 0xb31   : > { %s1793_s28 = scalar_lea.sflag [#allocation7], %s3010_s1  ;;  %s2348_s24 = scalar_lea.vmem %s1806_s21, 16 }
 0xb32   : > { %p2349_p2 = scmp.ne.s32.totalorder %s1806_s21, %s2348_s24  ;;  %s2462_s15 = smov [#allocation6]  }
 0xb33   : > { %s2352_s14 = sshll.u32 %s2462_s15, 4  ;;  %s2353_s14 = int_to_ptr.vmem [resolvable:$false] %s2352_s14 }
 0xb34   : > { %p2350_p4 = pnand %p2349_p2, %p2592_p3  ;;  %s2354_s2 = scalar_lea.vmem %s2353_s14, 32 }
 0xb35   : > { %s2052_s29 = sshll.u32 %s3007_s22, 4  ;;  %p2355_p6 = scmp.lt.s32.totalorder %s1806_s21, %s2353_s14 }
 0xb36   : > { %s2890_s0 = scalar_lea.hbm %s3009_s30, %s2052_s29  ;;  %p2351_p5 = pneg %p2350_p4 }
 0xb37   : > { %p2356_p7 = scmp.lt.s32.totalorder %s2354_s2, %s2348_s24 }
 0xb39   : > { %p2357_p8 = por %p2356_p7, %p2355_p6 }
 0xb3b   : > { %p2358_p10 = pnand %p2357_p8, %p2351_p5 }
 0xb3d   : > { %2361 = shalt.err (!%p2358_p10)
}
 0xb3e   : > { %s2362_s13 = scalar_lea.hbm %s2890_s0, 16  ;;  %s2366_s3 = scalar_lea.hbm %s3009_s30, 32 }
 0xb3f   : > { %p2363_p11 = scmp.ne.s32.totalorder %s2890_s0, %s2362_s13  ;;  %p2367_p0 = scmp.lt.u32.totalorder %s2890_s0, %s3009_s30 }
 0xb40   : > { %p2368_p1 = scmp.lt.u32.totalorder %s2366_s3, %s2362_s13  ;;  %p2370_p4 = scmp.lt.u32.totalorder %s2362_s13, %s2890_s0 }
 0xb41   : > { %p2364_p12 = pnand %p2363_p11, %p2592_p3 }
 0xb42   : > { %p2369_p2 = por %p2368_p1, %p2367_p0 }
 0xb43   : > { %p2365_p13 = pneg %p2364_p12 }
 0xb44   : > { %p2371_p5 = por %p2370_p4, %p2369_p2 }
 0xb46   : > { %p2372_p6 = pnand %p2371_p5, %p2365_p13 }
 0xb48   : > { %2375 = shalt.err (!%p2372_p6)
}
 0xb49   : > { %2217 = dma.vmem_to_hbm [thread:$0]  (%p2592_p3), %s1806_s21, 16, %s2890_s0, %s1793_s28  }
 0xb4a PF: > { %s3011_s27 = sld [smem:[#allocation15_spill]]  ;;  %s3012_s22 = sld [smem:[#allocation9_spill]] }
 0xb50   : > { %p2223_p7 = scmp.ge.s32.totalorder %s3011_s27, 2  ;;  %s1817_s18 = sand.u32 1, %s3012_s22  }
 0xb51   : > { %s1818_s20 = scalar_lea.sflag [#allocation7], %s1817_s18 }
 0xb52   : > { %p2220_p8 = pnand %p2223_p7, %p2602_p9 }
 0xb54   : > { %2409 = dma.done.wait (!%p2220_p8), %s1818_s20, 16  }
 0xb55   : > { %2411 = vsyncadd (!%p2220_p8), %s1818_s20, 4294967280  ;;  %s28_s25 = sadd.s32 1, %s3011_s27   ;;  %s3014_s1 = sld [smem:[#allocation10_spill]] }
 0xb56   : > { %p25_p10 = scmp.ge.s32.totalorder %s28_s25, 6   ;;  %s3015_s20 = sld [smem:[#allocation20_spill]] }
 0xb57   : > { %s3016_s21 = sld [smem:[#allocation13_spill]]  ;;  %s3017_s22 = sld [smem:[#allocation14_spill]] }
 0xb58   : > { %s3018_s23 = sld [smem:[#allocation16_spill]]  ;;  %s3019_s24 = sld [smem:[#allocation18_spill]] }
 0xb59   : > { %s3020_s18 = smov %s2418_s19  ;;  %27 = sbr.rel (!%p25_p10) target bundleno = 14 (0xe), region = 170 }
 0xb5b   : > { %s3021_s19 = smov %s3014_s1 }
 0xb60   :  { %1822 = vsyncpa [#allocation7], 1 }
 0xb61   :  { %1824 = vsyncpa [#allocation7 + $0x1], 1 }

</bundles_post_ra>
